<compile_context>
chip_gen: v7x
topology: tpu7x:2x2x1
jax: 0.10.0
libtpu: 0.0.40
codegen_flags: <defaults>
</compile_context>

<pallas_src>
import math
import functools

import jax
import jax.numpy as jnp
from jax import lax
from jax.experimental import pallas as pl
from jax.experimental.pallas import tpu as pltpu

LANE = 128


def rnn_kernel(x_ref, wih_ref, whh_ref, b_ref, h0_ref, c0_ref,
               wlin_hbm, blin_hbm,
               out_ref, hn_ref, cn_ref,
               xproj_ref, hs_ref, wlin_vmem, blin_vmem, dma_sem,
               *, valid_v, unroll):
    S = x_ref.shape[0]
    Hp = whh_ref.shape[0]                      # padded hidden size (multiple of 128)

    # ---- start the projection-weight DMA now; it completes behind the serial recurrence ----
    wlin_cp = pltpu.make_async_copy(wlin_hbm, wlin_vmem, dma_sem.at[0])
    blin_cp = pltpu.make_async_copy(blin_hbm, blin_vmem, dma_sem.at[1])
    wlin_cp.start()
    blin_cp.start()

    # ---- input projection hoisted out of the recurrence: one well-shaped bf16 MXU op ----
    xproj_ref[...] = (jnp.dot(x_ref[...].astype(jnp.bfloat16), wih_ref[...],
                              preferred_element_type=jnp.float32)
                      + b_ref[...])                                   # (S, 4*Hp) f32

    # ---- serial LSTM recurrence: one fused (1,Hp)@(Hp,4Hp) bf16 matmul + halved EUP work / step --
    def step(t, carry):
        h, c = carry                                                  # each (1, Hp) f32
        gates = xproj_ref[pl.ds(t, 1), :] + jnp.dot(
            h.astype(jnp.bfloat16), whh_ref[...],
            preferred_element_type=jnp.float32)                       # (1, 4*Hp) f32
        # packed gate order is (i, f, o, g): sigmoid over 3*Hp lanes, tanh over Hp lanes only
        sig = jax.nn.sigmoid(gates[:, 0:3 * Hp])
        g = jnp.tanh(gates[:, 3 * Hp:4 * Hp])
        i = sig[:, 0 * Hp:1 * Hp]                                     # 128-lane-aligned slices
        f = sig[:, 1 * Hp:2 * Hp]
        o = sig[:, 2 * Hp:3 * Hp]
        c_new = f * c + i * g
        h_new = o * jnp.tanh(c_new)
        hs_ref[pl.ds(t, 1), :] = h_new                                # lane-dense store
        return (h_new, c_new)

    h_fin, c_fin = lax.fori_loop(0, S, step, (h0_ref[...], c0_ref[...]),
                                 unroll=unroll)
    hn_ref[...] = h_fin
    cn_ref[...] = c_fin

    # ---- projection weights must have landed by now (DMA hidden behind the loop) ----
    wlin_cp.wait()
    blin_cp.wait()

    # ---- Linear -> ReLU -> LogSoftmax over the real vocab columns (padded cols masked) ----
    hs = hs_ref[...]                                                  # (S, Hp) f32
    logits = jnp.dot(hs.astype(jnp.bfloat16), wlin_vmem[...],
                     preferred_element_type=jnp.float32) + blin_vmem[...]   # (S, Vp) f32
    act = jnp.maximum(logits, 0.0)
    col = lax.broadcasted_iota(jnp.int32, act.shape, 1)
    valid = col < valid_v
    # relu >= 0 and padded columns are exactly 0, so the row max is unaffected by padding.
    m = jnp.max(act, axis=-1, keepdims=True)
    p = jnp.where(valid, jnp.exp(act - m), 0.0)
    lse = jnp.log(jnp.sum(p, axis=-1, keepdims=True))
    out_ref[...] = act - m - lse


def _full_spec(shape):
    ndim = len(shape)
    return pl.BlockSpec(shape, lambda i, _n=ndim: (0,) * _n)


def _pad_up(n, m):
    return ((n + m - 1) // m) * m


def prepare_params(params):
    """One-time weight fusion / transposition / lane padding / bf16 cast (hoisted out of forward)."""
    emb = params["embedding"]                 # (V, E)
    V, E = emb.shape
    H = params["w_hh"].shape[1]
    Hp = max(LANE, _pad_up(H, LANE))
    Vp = max(LANE, _pad_up(V, LANE))

    w_ih = params["w_ih"].reshape(4, H, E)    # PyTorch gate order (i, f, g, o)
    w_hh = params["w_hh"].reshape(4, H, H)
    b = (params["b_ih"] + params["b_hh"]).reshape(4, H)

    w_ih_f = jnp.zeros((E, 4 * Hp), jnp.float32)
    w_hh_f = jnp.zeros((Hp, 4 * Hp), jnp.float32)
    b_f = jnp.zeros((1, 4 * Hp), jnp.float32)
    # Packed gate order (i, f, o, g): sigmoid covers slots 0..2, tanh covers slot 3.
    for dst, src in enumerate((0, 1, 3, 2)):
        w_ih_f = w_ih_f.at[:, dst * Hp:dst * Hp + H].set(w_ih[src].T)
        w_hh_f = w_hh_f.at[:H, dst * Hp:dst * Hp + H].set(w_hh[src].T)
        b_f = b_f.at[:, dst * Hp:dst * Hp + H].set(b[src][None, :])

    w_lin_f = jnp.zeros((Hp, Vp), jnp.float32).at[:H, :V].set(params["w_lin"].T)
    b_lin_f = jnp.zeros((1, Vp), jnp.float32).at[:, :V].set(params["b_lin"][None, :])

    return dict(embedding=emb,
                w_ih_f=w_ih_f.astype(jnp.bfloat16),     # 0 is exact in bf16: padding stays 0
                w_hh_f=w_hh_f.astype(jnp.bfloat16),
                b_f=b_f,                                 # bias + state stay f32
                w_lin_f=w_lin_f.astype(jnp.bfloat16),
                b_lin_f=b_lin_f)


def _vmem_limit_bytes(S, E, Hp, Vp):
    f32, bf16 = 4, 2
    dbl = 2  # BlockSpec-managed blocks are double-buffered
    needed = (S * E * f32 * dbl                 # x_emb
              + E * 4 * Hp * bf16 * dbl         # w_ih_f
              + Hp * 4 * Hp * bf16 * dbl        # w_hh_f
              + 4 * Hp * f32 * dbl              # b_f
              + 2 * Hp * f32 * dbl              # h0, c0
              + S * Vp * f32 * dbl              # out
              + 2 * Hp * f32 * dbl              # hn, cn
              + S * 4 * Hp * f32                # xproj scratch
              + S * Hp * f32                    # hs scratch
              + Hp * Vp * bf16                  # w_lin scratch (single-buffered, manual DMA)
              + Vp * f32)                       # b_lin scratch
    # headroom, clamped under v7x's 64 MiB physical VMEM
    return int(min(max(2 * needed + (4 << 20), 16 << 20), 48 << 20))


@jax.jit
def rnn_forward(input_ids, hidden, prep):
    """Mirrors RNN.forward(input, hidden) from the PyTorch module (batch=1, seq-first)."""
    emb = prep["embedding"]                   # (V, E)
    V, E = emb.shape
    Hp = prep["w_hh_f"].shape[0]
    Vp = prep["w_lin_f"].shape[1]
    S = input_ids.shape[0]
    H = hidden[0].shape[-1]

    # glue: embedding lookup + zero-padded initial state (plain JAX)
    # TODO(synk): embedding gather could be fused via PrefetchScalarGridSpec + pl.Element row
    #             gather; negligible at these sizes.
    x_emb = emb[input_ids]                                              # (S, E) f32
    h0 = jnp.zeros((1, Hp), jnp.float32).at[:, :H].set(hidden[0].reshape(1, H))
    c0 = jnp.zeros((1, Hp), jnp.float32).at[:, :H].set(hidden[1].reshape(1, H))

    kernel = functools.partial(rnn_kernel, valid_v=V, unroll=min(8, max(S, 1)))

    out_p, h_n, c_n = pl.pallas_call(
        kernel,
        out_shape=(
            jax.ShapeDtypeStruct((S, Vp), jnp.float32),
            jax.ShapeDtypeStruct((1, Hp), jnp.float32),
            jax.ShapeDtypeStruct((1, Hp), jnp.float32),
        ),
        grid=(1,),
        in_specs=[
            _full_spec((S, E)),
            _full_spec((E, 4 * Hp)),
            _full_spec((Hp, 4 * Hp)),
            _full_spec((1, 4 * Hp)),
            _full_spec((1, Hp)),
            _full_spec((1, Hp)),
            pl.BlockSpec(memory_space=pl.ANY),      # w_lin_f stays in HBM; manual DMA in-kernel
            pl.BlockSpec(memory_space=pl.ANY),      # b_lin_f stays in HBM; manual DMA in-kernel
        ],
        out_specs=(
            _full_spec((S, Vp)),
            _full_spec((1, Hp)),
            _full_spec((1, Hp)),
        ),
        scratch_shapes=[
            pltpu.VMEM((S, 4 * Hp), jnp.float32),   # hoisted input projection
            pltpu.VMEM((S, Hp), jnp.float32),       # per-step hidden states
            pltpu.VMEM((Hp, Vp), jnp.bfloat16),     # DMA landing buffer for w_lin_f
            pltpu.VMEM((1, Vp), jnp.float32),       # DMA landing buffer for b_lin_f
            pltpu.SemaphoreType.DMA((2,)),
        ],
        compiler_params=pltpu.CompilerParams(
            dimension_semantics=("arbitrary",),
            vmem_limit_bytes=_vmem_limit_bytes(S, E, Hp, Vp)),
    )(x_emb, prep["w_ih_f"], prep["w_hh_f"], prep["b_f"], h0, c0,
      prep["w_lin_f"], prep["b_lin_f"])

    out = out_p[:, :V]
    h_n = h_n[:, :H].reshape(1, 1, H)
    c_n = c_n[:, :H].reshape(1, 1, H)
    return out, (h_n, c_n)


def make_params(key, vocab, E, H):
    """Deterministic parameter init matching the module's shapes/init style."""
    ks = jax.random.split(key, 7)
    stdv = 1.0 / math.sqrt(H)
    return dict(
        embedding=jax.random.normal(ks[0], (vocab, E), jnp.float32),            # nn.Embedding ~ N(0,1)
        w_ih=jax.random.uniform(ks[1], (4 * H, E), jnp.float32, -stdv, stdv),   # LSTM uniform(-1/sqrt(H), 1/sqrt(H))
        w_hh=jax.random.uniform(ks[2], (4 * H, H), jnp.float32, -stdv, stdv),
        b_ih=jax.random.uniform(ks[3], (4 * H,), jnp.float32, -stdv, stdv),
        b_hh=jax.random.uniform(ks[4], (4 * H,), jnp.float32, -stdv, stdv),
        w_lin=jax.random.uniform(ks[5], (vocab, H), jnp.float32, -stdv, stdv),  # nn.Linear(H, vocab)
        b_lin=jax.random.uniform(ks[6], (vocab,), jnp.float32, -stdv, stdv),
    )


def reference_forward(input_ids, hidden, params):
    """Pure-JAX f32 reference reproducing the PyTorch forward semantics."""
    emb = params["embedding"]
    H = params["w_hh"].shape[1]
    x = emb[input_ids]                                         # (S, E)
    w_ih, w_hh = params["w_ih"], params["w_hh"]
    b = params["b_ih"] + params["b_hh"]
    h = hidden[0].reshape(1, H)
    c = hidden[1].reshape(1, H)

    def step(carry, x_t):
        h, c = carry
        gates = x_t[None, :] @ w_ih.T + h @ w_hh.T + b[None, :]
        i, f, g, o = jnp.split(gates, 4, axis=-1)              # PyTorch gate order (i, f, g, o)
        i, f, o = jax.nn.sigmoid(i), jax.nn.sigmoid(f), jax.nn.sigmoid(o)
        g = jnp.tanh(g)
        c_new = f * c + i * g
        h_new = o * jnp.tanh(c_new)
        return (h_new, c_new), h_new[0]

    (h_f, c_f), hs = lax.scan(step, (h, c), x)
    logits = hs @ params["w_lin"].T + params["b_lin"]
    act = jnp.maximum(logits, 0.0)
    out = jax.nn.log_softmax(act, axis=-1)
    return out, (h_f.reshape(1, 1, H), c_f.reshape(1, 1, H))


if __name__ == "__main__":
    VOCAB, EMBED, HIDDEN, SEQ = 32, 16, 32, 8

    key = jax.random.PRNGKey(0)
    k_params, k_ids = jax.random.split(key)
    params = make_params(k_params, VOCAB, EMBED, HIDDEN)
    prep = prepare_params(params)   # one-time weight fusion / padding / bf16 cast

    input_ids = jax.random.randint(k_ids, (SEQ,), 0, VOCAB, dtype=jnp.int32)
    hidden0 = (jnp.zeros((1, 1, HIDDEN), jnp.float32),
               jnp.zeros((1, 1, HIDDEN), jnp.float32))

    out, (h_n, c_n) = rnn_forward(input_ids, hidden0, prep)
    jax.block_until_ready((out, h_n, c_n))

    ref_out, (ref_h, ref_c) = reference_forward(input_ids, hidden0, params)
    assert out.shape == (SEQ, VOCAB) and h_n.shape == (1, 1, HIDDEN) and c_n.shape == (1, 1, HIDDEN)
    # bf16 matmul operands (f32 accumulation) vs. a pure-f32 reference -> looser tolerance.
    assert jnp.allclose(out, ref_out, atol=3e-2, rtol=3e-2)
    assert jnp.allclose(h_n, ref_h, atol=3e-2, rtol=3e-2)
    assert jnp.allclose(c_n, ref_c, atol=3e-2, rtol=3e-2)

    print("KERNEL_OK")
</pallas_src>

<mosaic_0001>
module attributes {stable_mosaic.version = 11 : i64} {
  func.func @rnn_kernel(%arg0: i32, %arg1: memref<8x16xf32, #tpu.memory_space<vmem>>, %arg2: memref<16x512xbf16, #tpu.memory_space<vmem>>, %arg3: memref<128x512xbf16, #tpu.memory_space<vmem>>, %arg4: memref<1x512xf32, #tpu.memory_space<vmem>>, %arg5: memref<1x128xf32, #tpu.memory_space<vmem>>, %arg6: memref<1x128xf32, #tpu.memory_space<vmem>>, %arg7: memref<128x128xbf16, #tpu.memory_space<any>>, %arg8: memref<1x128xf32, #tpu.memory_space<any>>, %arg9: memref<8x128xf32, #tpu.memory_space<vmem>>, %arg10: memref<1x128xf32, #tpu.memory_space<vmem>>, %arg11: memref<1x128xf32, #tpu.memory_space<vmem>>, %arg12: memref<8x512xf32, #tpu.memory_space<vmem>>, %arg13: memref<8x128xf32, #tpu.memory_space<vmem>>, %arg14: memref<128x128xbf16, #tpu.memory_space<vmem>>, %arg15: memref<1x128xf32, #tpu.memory_space<vmem>>, %arg16: memref<2x!tpu.dma_semaphore, #tpu.memory_space<semaphore_mem>>) attributes {dimension_semantics = [#tpu.dimension_semantics<arbitrary>], iteration_bounds = array<i64: 1>, scalar_prefetch = 0 : i64, scratch_operands = 5 : i64, tpu.core_type = #tpu.core_type<tc>, window_params = [{pipeline_mode = #tpu.pipeline_mode<synchronous>, transform_indices = @transform_0, window_bounds = array<i64: 8, 16>}, {pipeline_mode = #tpu.pipeline_mode<synchronous>, transform_indices = @transform_1, window_bounds = array<i64: 16, 512>}, {pipeline_mode = #tpu.pipeline_mode<synchronous>, transform_indices = @transform_2, window_bounds = array<i64: 128, 512>}, {pipeline_mode = #tpu.pipeline_mode<synchronous>, transform_indices = @transform_3, window_bounds = array<i64: 1, 512>}, {pipeline_mode = #tpu.pipeline_mode<synchronous>, transform_indices = @transform_4, window_bounds = array<i64: 1, 128>}, {pipeline_mode = #tpu.pipeline_mode<synchronous>, transform_indices = @transform_5, window_bounds = array<i64: 1, 128>}, {}, {}, {pipeline_mode = #tpu.pipeline_mode<synchronous>, transform_indices = @transform_8, window_bounds = array<i64: 8, 128>}, {pipeline_mode = #tpu.pipeline_mode<synchronous>, transform_indices = @transform_9, window_bounds = array<i64: 1, 128>}, {pipeline_mode = #tpu.pipeline_mode<synchronous>, transform_indices = @transform_10, window_bounds = array<i64: 1, 128>}]} {
    %c0_i32 = arith.constant 0 : i32
    %0 = tpu.memref_slice %arg16[%c0_i32] : memref<2x!tpu.dma_semaphore, #tpu.memory_space<semaphore_mem>> -> memref<1x!tpu.dma_semaphore, #tpu.memory_space<semaphore_mem>>
    %1 = tpu.memref_squeeze %0 : memref<1x!tpu.dma_semaphore, #tpu.memory_space<semaphore_mem>> -> memref<!tpu.dma_semaphore, #tpu.memory_space<semaphore_mem>>
    tpu.enqueue_dma source(%arg7 : memref<128x128xbf16, #tpu.memory_space<any>>) target(%arg14 : memref<128x128xbf16, #tpu.memory_space<vmem>>) target_semaphore(%1 : memref<!tpu.dma_semaphore, #tpu.memory_space<semaphore_mem>>)
    %c1_i32 = arith.constant 1 : i32
    %2 = tpu.memref_slice %arg16[%c1_i32] : memref<2x!tpu.dma_semaphore, #tpu.memory_space<semaphore_mem>> -> memref<1x!tpu.dma_semaphore, #tpu.memory_space<semaphore_mem>>
    %3 = tpu.memref_squeeze %2 : memref<1x!tpu.dma_semaphore, #tpu.memory_space<semaphore_mem>> -> memref<!tpu.dma_semaphore, #tpu.memory_space<semaphore_mem>>
    tpu.enqueue_dma source(%arg8 : memref<1x128xf32, #tpu.memory_space<any>>) target(%arg15 : memref<1x128xf32, #tpu.memory_space<vmem>>) target_semaphore(%3 : memref<!tpu.dma_semaphore, #tpu.memory_space<semaphore_mem>>)
    %c0 = arith.constant 0 : index
    %c0_0 = arith.constant 0 : index
    %4 = vector.load %arg1[%c0, %c0_0] : memref<8x16xf32, #tpu.memory_space<vmem>>, vector<8x16xf32>
    %5 = arith.truncf %4 : vector<8x16xf32> to vector<8x16xbf16>
    %c0_1 = arith.constant 0 : index
    %c0_2 = arith.constant 0 : index
    %6 = vector.load %arg2[%c0_1, %c0_2] : memref<16x512xbf16, #tpu.memory_space<vmem>>, vector<16x512xbf16>
    %cst = arith.constant dense<0.000000e+00> : vector<8x512xf32>
    %7 = tpu.matmul %5, %6, %cst {dimension_numbers = #tpu.dot_dimension_numbers<[1], [0], [0], [1], [0, 0, 1, 1], [], []>} : vector<8x16xbf16>, vector<16x512xbf16>, vector<8x512xf32> -> vector<8x512xf32>
    %c0_3 = arith.constant 0 : index
    %c0_4 = arith.constant 0 : index
    %8 = vector.load %arg4[%c0_3, %c0_4] : memref<1x512xf32, #tpu.memory_space<vmem>>, vector<1x512xf32>
    %9 = vector.broadcast %8 : vector<1x512xf32> to vector<8x512xf32>
    %10 = arith.addf %7, %9 : vector<8x512xf32>
    %c0_5 = arith.constant 0 : index
    %c0_6 = arith.constant 0 : index
    %11 = vector.load %arg12[%c0_5, %c0_6] : memref<8x512xf32, #tpu.memory_space<vmem>>, vector<8x512xf32>
    tpu.vector_store %arg12[%c0_5, %c0_6], %10 {strides = array<i32>} : memref<8x512xf32, #tpu.memory_space<vmem>>, vector<8x512xf32>,
    %c0_7 = arith.constant 0 : index
    %c0_8 = arith.constant 0 : index
    %12 = vector.load %arg5[%c0_7, %c0_8] : memref<1x128xf32, #tpu.memory_space<vmem>>, vector<1x128xf32>
    %c0_9 = arith.constant 0 : index
    %c0_10 = arith.constant 0 : index
    %13 = vector.load %arg6[%c0_9, %c0_10] : memref<1x128xf32, #tpu.memory_space<vmem>>, vector<1x128xf32>
    %c0_i32_11 = arith.constant 0 : i32
    %14 = arith.index_cast %c0_i32_11 : i32 to index
    %c0_12 = arith.constant 0 : index
    %15 = vector.load %arg12[%14, %c0_12] : memref<8x512xf32, #tpu.memory_space<vmem>>, vector<1x512xf32>
    %16 = arith.truncf %12 : vector<1x128xf32> to vector<1x128xbf16>
    %c0_13 = arith.constant 0 : index
    %c0_14 = arith.constant 0 : index
    %17 = vector.load %arg3[%c0_13, %c0_14] : memref<128x512xbf16, #tpu.memory_space<vmem>>, vector<128x512xbf16>
    %cst_15 = arith.constant dense<0.000000e+00> : vector<1x512xf32>
    %18 = tpu.matmul %16, %17, %cst_15 {dimension_numbers = #tpu.dot_dimension_numbers<[1], [0], [0], [1], [0, 0, 1, 1], [], []>} : vector<1x128xbf16>, vector<128x512xbf16>, vector<1x512xf32> -> vector<1x512xf32>
    %19 = arith.addf %15, %18 : vector<1x512xf32>
    %20 = vector.extract_strided_slice %19 {offsets = [0, 0], sizes = [1, 384], strides = [1, 1]} : vector<1x512xf32> to vector<1x384xf32>
    %21 = arith.negf %20 : vector<1x384xf32>
    %22 = math.exp %21 : vector<1x384xf32>
    %cst_16 = arith.constant 1.000000e+00 : f32
    %23 = vector.broadcast %cst_16 : f32 to vector<1x384xf32>
    %24 = arith.addf %23, %22 : vector<1x384xf32>
    %25 = arith.divf %23, %24 : vector<1x384xf32>
    %26 = vector.extract_strided_slice %19 {offsets = [0, 384], sizes = [1, 128], strides = [1, 1]} : vector<1x512xf32> to vector<1x128xf32>
    %27 = math.tanh %26 : vector<1x128xf32>
    %28 = vector.extract_strided_slice %25 {offsets = [0, 0], sizes = [1, 128], strides = [1, 1]} : vector<1x384xf32> to vector<1x128xf32>
    %29 = vector.extract_strided_slice %25 {offsets = [0, 128], sizes = [1, 128], strides = [1, 1]} : vector<1x384xf32> to vector<1x128xf32>
    %30 = vector.extract_strided_slice %25 {offsets = [0, 256], sizes = [1, 128], strides = [1, 1]} : vector<1x384xf32> to vector<1x128xf32>
    %31 = arith.mulf %29, %13 : vector<1x128xf32>
    %32 = arith.mulf %28, %27 : vector<1x128xf32>
    %33 = arith.addf %31, %32 : vector<1x128xf32>
    %34 = math.tanh %33 : vector<1x128xf32>
    %35 = arith.mulf %30, %34 : vector<1x128xf32>
    %36 = arith.index_cast %c0_i32_11 : i32 to index
    %c0_17 = arith.constant 0 : index
    %37 = vector.load %arg13[%36, %c0_17] : memref<8x128xf32, #tpu.memory_space<vmem>>, vector<1x128xf32>
    tpu.vector_store %arg13[%36, %c0_17], %35 {strides = array<i32>} : memref<8x128xf32, #tpu.memory_space<vmem>>, vector<1x128xf32>,
    %c1_i32_18 = arith.constant 1 : i32
    %38 = arith.index_cast %c1_i32_18 : i32 to index
    %c0_19 = arith.constant 0 : index
    %39 = vector.load %arg12[%38, %c0_19] : memref<8x512xf32, #tpu.memory_space<vmem>>, vector<1x512xf32>
    %40 = arith.truncf %35 : vector<1x128xf32> to vector<1x128xbf16>
    %c0_20 = arith.constant 0 : index
    %c0_21 = arith.constant 0 : index
    %41 = vector.load %arg3[%c0_20, %c0_21] : memref<128x512xbf16, #tpu.memory_space<vmem>>, vector<128x512xbf16>
    %cst_22 = arith.constant dense<0.000000e+00> : vector<1x512xf32>
    %42 = tpu.matmul %40, %41, %cst_22 {dimension_numbers = #tpu.dot_dimension_numbers<[1], [0], [0], [1], [0, 0, 1, 1], [], []>} : vector<1x128xbf16>, vector<128x512xbf16>, vector<1x512xf32> -> vector<1x512xf32>
    %43 = arith.addf %39, %42 : vector<1x512xf32>
    %44 = vector.extract_strided_slice %43 {offsets = [0, 0], sizes = [1, 384], strides = [1, 1]} : vector<1x512xf32> to vector<1x384xf32>
    %45 = arith.negf %44 : vector<1x384xf32>
    %46 = math.exp %45 : vector<1x384xf32>
    %cst_23 = arith.constant 1.000000e+00 : f32
    %47 = vector.broadcast %cst_23 : f32 to vector<1x384xf32>
    %48 = arith.addf %47, %46 : vector<1x384xf32>
    %49 = arith.divf %47, %48 : vector<1x384xf32>
    %50 = vector.extract_strided_slice %43 {offsets = [0, 384], sizes = [1, 128], strides = [1, 1]} : vector<1x512xf32> to vector<1x128xf32>
    %51 = math.tanh %50 : vector<1x128xf32>
    %52 = vector.extract_strided_slice %49 {offsets = [0, 0], sizes = [1, 128], strides = [1, 1]} : vector<1x384xf32> to vector<1x128xf32>
    %53 = vector.extract_strided_slice %49 {offsets = [0, 128], sizes = [1, 128], strides = [1, 1]} : vector<1x384xf32> to vector<1x128xf32>
    %54 = vector.extract_strided_slice %49 {offsets = [0, 256], sizes = [1, 128], strides = [1, 1]} : vector<1x384xf32> to vector<1x128xf32>
    %55 = arith.mulf %53, %33 : vector<1x128xf32>
    %56 = arith.mulf %52, %51 : vector<1x128xf32>
    %57 = arith.addf %55, %56 : vector<1x128xf32>
    %58 = math.tanh %57 : vector<1x128xf32>
    %59 = arith.mulf %54, %58 : vector<1x128xf32>
    %60 = arith.index_cast %c1_i32_18 : i32 to index
    %c0_24 = arith.constant 0 : index
    %61 = vector.load %arg13[%60, %c0_24] : memref<8x128xf32, #tpu.memory_space<vmem>>, vector<1x128xf32>
    tpu.vector_store %arg13[%60, %c0_24], %59 {strides = array<i32>} : memref<8x128xf32, #tpu.memory_space<vmem>>, vector<1x128xf32>,
    %c2_i32 = arith.constant 2 : i32
    %62 = arith.index_cast %c2_i32 : i32 to index
    %c0_25 = arith.constant 0 : index
    %63 = vector.load %arg12[%62, %c0_25] : memref<8x512xf32, #tpu.memory_space<vmem>>, vector<1x512xf32>
    %64 = arith.truncf %59 : vector<1x128xf32> to vector<1x128xbf16>
    %c0_26 = arith.constant 0 : index
    %c0_27 = arith.constant 0 : index
    %65 = vector.load %arg3[%c0_26, %c0_27] : memref<128x512xbf16, #tpu.memory_space<vmem>>, vector<128x512xbf16>
    %cst_28 = arith.constant dense<0.000000e+00> : vector<1x512xf32>
    %66 = tpu.matmul %64, %65, %cst_28 {dimension_numbers = #tpu.dot_dimension_numbers<[1], [0], [0], [1], [0, 0, 1, 1], [], []>} : vector<1x128xbf16>, vector<128x512xbf16>, vector<1x512xf32> -> vector<1x512xf32>
    %67 = arith.addf %63, %66 : vector<1x512xf32>
    %68 = vector.extract_strided_slice %67 {offsets = [0, 0], sizes = [1, 384], strides = [1, 1]} : vector<1x512xf32> to vector<1x384xf32>
    %69 = arith.negf %68 : vector<1x384xf32>
    %70 = math.exp %69 : vector<1x384xf32>
    %cst_29 = arith.constant 1.000000e+00 : f32
    %71 = vector.broadcast %cst_29 : f32 to vector<1x384xf32>
    %72 = arith.addf %71, %70 : vector<1x384xf32>
    %73 = arith.divf %71, %72 : vector<1x384xf32>
    %74 = vector.extract_strided_slice %67 {offsets = [0, 384], sizes = [1, 128], strides = [1, 1]} : vector<1x512xf32> to vector<1x128xf32>
    %75 = math.tanh %74 : vector<1x128xf32>
    %76 = vector.extract_strided_slice %73 {offsets = [0, 0], sizes = [1, 128], strides = [1, 1]} : vector<1x384xf32> to vector<1x128xf32>
    %77 = vector.extract_strided_slice %73 {offsets = [0, 128], sizes = [1, 128], strides = [1, 1]} : vector<1x384xf32> to vector<1x128xf32>
    %78 = vector.extract_strided_slice %73 {offsets = [0, 256], sizes = [1, 128], strides = [1, 1]} : vector<1x384xf32> to vector<1x128xf32>
    %79 = arith.mulf %77, %57 : vector<1x128xf32>
    %80 = arith.mulf %76, %75 : vector<1x128xf32>
    %81 = arith.addf %79, %80 : vector<1x128xf32>
    %82 = math.tanh %81 : vector<1x128xf32>
    %83 = arith.mulf %78, %82 : vector<1x128xf32>
    %84 = arith.index_cast %c2_i32 : i32 to index
    %c0_30 = arith.constant 0 : index
    %85 = vector.load %arg13[%84, %c0_30] : memref<8x128xf32, #tpu.memory_space<vmem>>, vector<1x128xf32>
    tpu.vector_store %arg13[%84, %c0_30], %83 {strides = array<i32>} : memref<8x128xf32, #tpu.memory_space<vmem>>, vector<1x128xf32>,
    %c3_i32 = arith.constant 3 : i32
    %86 = arith.index_cast %c3_i32 : i32 to index
    %c0_31 = arith.constant 0 : index
    %87 = vector.load %arg12[%86, %c0_31] : memref<8x512xf32, #tpu.memory_space<vmem>>, vector<1x512xf32>
    %88 = arith.truncf %83 : vector<1x128xf32> to vector<1x128xbf16>
    %c0_32 = arith.constant 0 : index
    %c0_33 = arith.constant 0 : index
    %89 = vector.load %arg3[%c0_32, %c0_33] : memref<128x512xbf16, #tpu.memory_space<vmem>>, vector<128x512xbf16>
    %cst_34 = arith.constant dense<0.000000e+00> : vector<1x512xf32>
    %90 = tpu.matmul %88, %89, %cst_34 {dimension_numbers = #tpu.dot_dimension_numbers<[1], [0], [0], [1], [0, 0, 1, 1], [], []>} : vector<1x128xbf16>, vector<128x512xbf16>, vector<1x512xf32> -> vector<1x512xf32>
    %91 = arith.addf %87, %90 : vector<1x512xf32>
    %92 = vector.extract_strided_slice %91 {offsets = [0, 0], sizes = [1, 384], strides = [1, 1]} : vector<1x512xf32> to vector<1x384xf32>
    %93 = arith.negf %92 : vector<1x384xf32>
    %94 = math.exp %93 : vector<1x384xf32>
    %cst_35 = arith.constant 1.000000e+00 : f32
    %95 = vector.broadcast %cst_35 : f32 to vector<1x384xf32>
    %96 = arith.addf %95, %94 : vector<1x384xf32>
    %97 = arith.divf %95, %96 : vector<1x384xf32>
    %98 = vector.extract_strided_slice %91 {offsets = [0, 384], sizes = [1, 128], strides = [1, 1]} : vector<1x512xf32> to vector<1x128xf32>
    %99 = math.tanh %98 : vector<1x128xf32>
    %100 = vector.extract_strided_slice %97 {offsets = [0, 0], sizes = [1, 128], strides = [1, 1]} : vector<1x384xf32> to vector<1x128xf32>
    %101 = vector.extract_strided_slice %97 {offsets = [0, 128], sizes = [1, 128], strides = [1, 1]} : vector<1x384xf32> to vector<1x128xf32>
    %102 = vector.extract_strided_slice %97 {offsets = [0, 256], sizes = [1, 128], strides = [1, 1]} : vector<1x384xf32> to vector<1x128xf32>
    %103 = arith.mulf %101, %81 : vector<1x128xf32>
    %104 = arith.mulf %100, %99 : vector<1x128xf32>
    %105 = arith.addf %103, %104 : vector<1x128xf32>
    %106 = math.tanh %105 : vector<1x128xf32>
    %107 = arith.mulf %102, %106 : vector<1x128xf32>
    %108 = arith.index_cast %c3_i32 : i32 to index
    %c0_36 = arith.constant 0 : index
    %109 = vector.load %arg13[%108, %c0_36] : memref<8x128xf32, #tpu.memory_space<vmem>>, vector<1x128xf32>
    tpu.vector_store %arg13[%108, %c0_36], %107 {strides = array<i32>} : memref<8x128xf32, #tpu.memory_space<vmem>>, vector<1x128xf32>,
    %c4_i32 = arith.constant 4 : i32
    %110 = arith.index_cast %c4_i32 : i32 to index
    %c0_37 = arith.constant 0 : index
    %111 = vector.load %arg12[%110, %c0_37] : memref<8x512xf32, #tpu.memory_space<vmem>>, vector<1x512xf32>
    %112 = arith.truncf %107 : vector<1x128xf32> to vector<1x128xbf16>
    %c0_38 = arith.constant 0 : index
    %c0_39 = arith.constant 0 : index
    %113 = vector.load %arg3[%c0_38, %c0_39] : memref<128x512xbf16, #tpu.memory_space<vmem>>, vector<128x512xbf16>
    %cst_40 = arith.constant dense<0.000000e+00> : vector<1x512xf32>
    %114 = tpu.matmul %112, %113, %cst_40 {dimension_numbers = #tpu.dot_dimension_numbers<[1], [0], [0], [1], [0, 0, 1, 1], [], []>} : vector<1x128xbf16>, vector<128x512xbf16>, vector<1x512xf32> -> vector<1x512xf32>
    %115 = arith.addf %111, %114 : vector<1x512xf32>
    %116 = vector.extract_strided_slice %115 {offsets = [0, 0], sizes = [1, 384], strides = [1, 1]} : vector<1x512xf32> to vector<1x384xf32>
    %117 = arith.negf %116 : vector<1x384xf32>
    %118 = math.exp %117 : vector<1x384xf32>
    %cst_41 = arith.constant 1.000000e+00 : f32
    %119 = vector.broadcast %cst_41 : f32 to vector<1x384xf32>
    %120 = arith.addf %119, %118 : vector<1x384xf32>
    %121 = arith.divf %119, %120 : vector<1x384xf32>
    %122 = vector.extract_strided_slice %115 {offsets = [0, 384], sizes = [1, 128], strides = [1, 1]} : vector<1x512xf32> to vector<1x128xf32>
    %123 = math.tanh %122 : vector<1x128xf32>
    %124 = vector.extract_strided_slice %121 {offsets = [0, 0], sizes = [1, 128], strides = [1, 1]} : vector<1x384xf32> to vector<1x128xf32>
    %125 = vector.extract_strided_slice %121 {offsets = [0, 128], sizes = [1, 128], strides = [1, 1]} : vector<1x384xf32> to vector<1x128xf32>
    %126 = vector.extract_strided_slice %121 {offsets = [0, 256], sizes = [1, 128], strides = [1, 1]} : vector<1x384xf32> to vector<1x128xf32>
    %127 = arith.mulf %125, %105 : vector<1x128xf32>
    %128 = arith.mulf %124, %123 : vector<1x128xf32>
    %129 = arith.addf %127, %128 : vector<1x128xf32>
    %130 = math.tanh %129 : vector<1x128xf32>
    %131 = arith.mulf %126, %130 : vector<1x128xf32>
    %132 = arith.index_cast %c4_i32 : i32 to index
    %c0_42 = arith.constant 0 : index
    %133 = vector.load %arg13[%132, %c0_42] : memref<8x128xf32, #tpu.memory_space<vmem>>, vector<1x128xf32>
    tpu.vector_store %arg13[%132, %c0_42], %131 {strides = array<i32>} : memref<8x128xf32, #tpu.memory_space<vmem>>, vector<1x128xf32>,
    %c5_i32 = arith.constant 5 : i32
    %134 = arith.index_cast %c5_i32 : i32 to index
    %c0_43 = arith.constant 0 : index
    %135 = vector.load %arg12[%134, %c0_43] : memref<8x512xf32, #tpu.memory_space<vmem>>, vector<1x512xf32>
    %136 = arith.truncf %131 : vector<1x128xf32> to vector<1x128xbf16>
    %c0_44 = arith.constant 0 : index
    %c0_45 = arith.constant 0 : index
    %137 = vector.load %arg3[%c0_44, %c0_45] : memref<128x512xbf16, #tpu.memory_space<vmem>>, vector<128x512xbf16>
    %cst_46 = arith.constant dense<0.000000e+00> : vector<1x512xf32>
    %138 = tpu.matmul %136, %137, %cst_46 {dimension_numbers = #tpu.dot_dimension_numbers<[1], [0], [0], [1], [0, 0, 1, 1], [], []>} : vector<1x128xbf16>, vector<128x512xbf16>, vector<1x512xf32> -> vector<1x512xf32>
    %139 = arith.addf %135, %138 : vector<1x512xf32>
    %140 = vector.extract_strided_slice %139 {offsets = [0, 0], sizes = [1, 384], strides = [1, 1]} : vector<1x512xf32> to vector<1x384xf32>
    %141 = arith.negf %140 : vector<1x384xf32>
    %142 = math.exp %141 : vector<1x384xf32>
    %cst_47 = arith.constant 1.000000e+00 : f32
    %143 = vector.broadcast %cst_47 : f32 to vector<1x384xf32>
    %144 = arith.addf %143, %142 : vector<1x384xf32>
    %145 = arith.divf %143, %144 : vector<1x384xf32>
    %146 = vector.extract_strided_slice %139 {offsets = [0, 384], sizes = [1, 128], strides = [1, 1]} : vector<1x512xf32> to vector<1x128xf32>
    %147 = math.tanh %146 : vector<1x128xf32>
    %148 = vector.extract_strided_slice %145 {offsets = [0, 0], sizes = [1, 128], strides = [1, 1]} : vector<1x384xf32> to vector<1x128xf32>
    %149 = vector.extract_strided_slice %145 {offsets = [0, 128], sizes = [1, 128], strides = [1, 1]} : vector<1x384xf32> to vector<1x128xf32>
    %150 = vector.extract_strided_slice %145 {offsets = [0, 256], sizes = [1, 128], strides = [1, 1]} : vector<1x384xf32> to vector<1x128xf32>
    %151 = arith.mulf %149, %129 : vector<1x128xf32>
    %152 = arith.mulf %148, %147 : vector<1x128xf32>
    %153 = arith.addf %151, %152 : vector<1x128xf32>
    %154 = math.tanh %153 : vector<1x128xf32>
    %155 = arith.mulf %150, %154 : vector<1x128xf32>
    %156 = arith.index_cast %c5_i32 : i32 to index
    %c0_48 = arith.constant 0 : index
    %157 = vector.load %arg13[%156, %c0_48] : memref<8x128xf32, #tpu.memory_space<vmem>>, vector<1x128xf32>
    tpu.vector_store %arg13[%156, %c0_48], %155 {strides = array<i32>} : memref<8x128xf32, #tpu.memory_space<vmem>>, vector<1x128xf32>,
    %c6_i32 = arith.constant 6 : i32
    %158 = arith.index_cast %c6_i32 : i32 to index
    %c0_49 = arith.constant 0 : index
    %159 = vector.load %arg12[%158, %c0_49] : memref<8x512xf32, #tpu.memory_space<vmem>>, vector<1x512xf32>
    %160 = arith.truncf %155 : vector<1x128xf32> to vector<1x128xbf16>
    %c0_50 = arith.constant 0 : index
    %c0_51 = arith.constant 0 : index
    %161 = vector.load %arg3[%c0_50, %c0_51] : memref<128x512xbf16, #tpu.memory_space<vmem>>, vector<128x512xbf16>
    %cst_52 = arith.constant dense<0.000000e+00> : vector<1x512xf32>
    %162 = tpu.matmul %160, %161, %cst_52 {dimension_numbers = #tpu.dot_dimension_numbers<[1], [0], [0], [1], [0, 0, 1, 1], [], []>} : vector<1x128xbf16>, vector<128x512xbf16>, vector<1x512xf32> -> vector<1x512xf32>
    %163 = arith.addf %159, %162 : vector<1x512xf32>
    %164 = vector.extract_strided_slice %163 {offsets = [0, 0], sizes = [1, 384], strides = [1, 1]} : vector<1x512xf32> to vector<1x384xf32>
    %165 = arith.negf %164 : vector<1x384xf32>
    %166 = math.exp %165 : vector<1x384xf32>
    %cst_53 = arith.constant 1.000000e+00 : f32
    %167 = vector.broadcast %cst_53 : f32 to vector<1x384xf32>
    %168 = arith.addf %167, %166 : vector<1x384xf32>
    %169 = arith.divf %167, %168 : vector<1x384xf32>
    %170 = vector.extract_strided_slice %163 {offsets = [0, 384], sizes = [1, 128], strides = [1, 1]} : vector<1x512xf32> to vector<1x128xf32>
    %171 = math.tanh %170 : vector<1x128xf32>
    %172 = vector.extract_strided_slice %169 {offsets = [0, 0], sizes = [1, 128], strides = [1, 1]} : vector<1x384xf32> to vector<1x128xf32>
    %173 = vector.extract_strided_slice %169 {offsets = [0, 128], sizes = [1, 128], strides = [1, 1]} : vector<1x384xf32> to vector<1x128xf32>
    %174 = vector.extract_strided_slice %169 {offsets = [0, 256], sizes = [1, 128], strides = [1, 1]} : vector<1x384xf32> to vector<1x128xf32>
    %175 = arith.mulf %173, %153 : vector<1x128xf32>
    %176 = arith.mulf %172, %171 : vector<1x128xf32>
    %177 = arith.addf %175, %176 : vector<1x128xf32>
    %178 = math.tanh %177 : vector<1x128xf32>
    %179 = arith.mulf %174, %178 : vector<1x128xf32>
    %180 = arith.index_cast %c6_i32 : i32 to index
    %c0_54 = arith.constant 0 : index
    %181 = vector.load %arg13[%180, %c0_54] : memref<8x128xf32, #tpu.memory_space<vmem>>, vector<1x128xf32>
    tpu.vector_store %arg13[%180, %c0_54], %179 {strides = array<i32>} : memref<8x128xf32, #tpu.memory_space<vmem>>, vector<1x128xf32>,
    %c7_i32 = arith.constant 7 : i32
    %182 = arith.index_cast %c7_i32 : i32 to index
    %c0_55 = arith.constant 0 : index
    %183 = vector.load %arg12[%182, %c0_55] : memref<8x512xf32, #tpu.memory_space<vmem>>, vector<1x512xf32>
    %184 = arith.truncf %179 : vector<1x128xf32> to vector<1x128xbf16>
    %c0_56 = arith.constant 0 : index
    %c0_57 = arith.constant 0 : index
    %185 = vector.load %arg3[%c0_56, %c0_57] : memref<128x512xbf16, #tpu.memory_space<vmem>>, vector<128x512xbf16>
    %cst_58 = arith.constant dense<0.000000e+00> : vector<1x512xf32>
    %186 = tpu.matmul %184, %185, %cst_58 {dimension_numbers = #tpu.dot_dimension_numbers<[1], [0], [0], [1], [0, 0, 1, 1], [], []>} : vector<1x128xbf16>, vector<128x512xbf16>, vector<1x512xf32> -> vector<1x512xf32>
    %187 = arith.addf %183, %186 : vector<1x512xf32>
    %188 = vector.extract_strided_slice %187 {offsets = [0, 0], sizes = [1, 384], strides = [1, 1]} : vector<1x512xf32> to vector<1x384xf32>
    %189 = arith.negf %188 : vector<1x384xf32>
    %190 = math.exp %189 : vector<1x384xf32>
    %cst_59 = arith.constant 1.000000e+00 : f32
    %191 = vector.broadcast %cst_59 : f32 to vector<1x384xf32>
    %192 = arith.addf %191, %190 : vector<1x384xf32>
    %193 = arith.divf %191, %192 : vector<1x384xf32>
    %194 = vector.extract_strided_slice %187 {offsets = [0, 384], sizes = [1, 128], strides = [1, 1]} : vector<1x512xf32> to vector<1x128xf32>
    %195 = math.tanh %194 : vector<1x128xf32>
    %196 = vector.extract_strided_slice %193 {offsets = [0, 0], sizes = [1, 128], strides = [1, 1]} : vector<1x384xf32> to vector<1x128xf32>
    %197 = vector.extract_strided_slice %193 {offsets = [0, 128], sizes = [1, 128], strides = [1, 1]} : vector<1x384xf32> to vector<1x128xf32>
    %198 = vector.extract_strided_slice %193 {offsets = [0, 256], sizes = [1, 128], strides = [1, 1]} : vector<1x384xf32> to vector<1x128xf32>
    %199 = arith.mulf %197, %177 : vector<1x128xf32>
    %200 = arith.mulf %196, %195 : vector<1x128xf32>
    %201 = arith.addf %199, %200 : vector<1x128xf32>
    %202 = math.tanh %201 : vector<1x128xf32>
    %203 = arith.mulf %198, %202 : vector<1x128xf32>
    %204 = arith.index_cast %c7_i32 : i32 to index
    %c0_60 = arith.constant 0 : index
    %205 = vector.load %arg13[%204, %c0_60] : memref<8x128xf32, #tpu.memory_space<vmem>>, vector<1x128xf32>
    tpu.vector_store %arg13[%204, %c0_60], %203 {strides = array<i32>} : memref<8x128xf32, #tpu.memory_space<vmem>>, vector<1x128xf32>,
    %c8_i32 = arith.constant 8 : i32
    %c0_61 = arith.constant 0 : index
    %c0_62 = arith.constant 0 : index
    %206 = vector.load %arg10[%c0_61, %c0_62] : memref<1x128xf32, #tpu.memory_space<vmem>>, vector<1x128xf32>
    tpu.vector_store %arg10[%c0_61, %c0_62], %203 {strides = array<i32>} : memref<1x128xf32, #tpu.memory_space<vmem>>, vector<1x128xf32>,
    %c0_63 = arith.constant 0 : index
    %c0_64 = arith.constant 0 : index
    %207 = vector.load %arg11[%c0_63, %c0_64] : memref<1x128xf32, #tpu.memory_space<vmem>>, vector<1x128xf32>
    tpu.vector_store %arg11[%c0_63, %c0_64], %201 {strides = array<i32>} : memref<1x128xf32, #tpu.memory_space<vmem>>, vector<1x128xf32>,
    %c0_i32_65 = arith.constant 0 : i32
    %208 = tpu.memref_slice %arg16[%c0_i32_65] : memref<2x!tpu.dma_semaphore, #tpu.memory_space<semaphore_mem>> -> memref<1x!tpu.dma_semaphore, #tpu.memory_space<semaphore_mem>>
    %209 = tpu.memref_squeeze %208 : memref<1x!tpu.dma_semaphore, #tpu.memory_space<semaphore_mem>> -> memref<!tpu.dma_semaphore, #tpu.memory_space<semaphore_mem>>
    tpu.wait_dma2 semaphore(%209 : memref<!tpu.dma_semaphore, #tpu.memory_space<semaphore_mem>>) src(%arg7 : memref<128x128xbf16, #tpu.memory_space<any>>) dst(%arg14 : memref<128x128xbf16, #tpu.memory_space<vmem>>)
    %c1_i32_66 = arith.constant 1 : i32
    %210 = tpu.memref_slice %arg16[%c1_i32_66] : memref<2x!tpu.dma_semaphore, #tpu.memory_space<semaphore_mem>> -> memref<1x!tpu.dma_semaphore, #tpu.memory_space<semaphore_mem>>
    %211 = tpu.memref_squeeze %210 : memref<1x!tpu.dma_semaphore, #tpu.memory_space<semaphore_mem>> -> memref<!tpu.dma_semaphore, #tpu.memory_space<semaphore_mem>>
    tpu.wait_dma2 semaphore(%211 : memref<!tpu.dma_semaphore, #tpu.memory_space<semaphore_mem>>) src(%arg8 : memref<1x128xf32, #tpu.memory_space<any>>) dst(%arg15 : memref<1x128xf32, #tpu.memory_space<vmem>>)
    %c0_67 = arith.constant 0 : index
    %c0_68 = arith.constant 0 : index
    %212 = vector.load %arg13[%c0_67, %c0_68] : memref<8x128xf32, #tpu.memory_space<vmem>>, vector<8x128xf32>
    %213 = arith.truncf %212 : vector<8x128xf32> to vector<8x128xbf16>
    %c0_69 = arith.constant 0 : index
    %c0_70 = arith.constant 0 : index
    %214 = vector.load %arg14[%c0_69, %c0_70] : memref<128x128xbf16, #tpu.memory_space<vmem>>, vector<128x128xbf16>
    %cst_71 = arith.constant dense<0.000000e+00> : vector<8x128xf32>
    %215 = tpu.matmul %213, %214, %cst_71 {dimension_numbers = #tpu.dot_dimension_numbers<[1], [0], [0], [1], [0, 0, 1, 1], [], []>} : vector<8x128xbf16>, vector<128x128xbf16>, vector<8x128xf32> -> vector<8x128xf32>
    %c0_72 = arith.constant 0 : index
    %c0_73 = arith.constant 0 : index
    %216 = vector.load %arg15[%c0_72, %c0_73] : memref<1x128xf32, #tpu.memory_space<vmem>>, vector<1x128xf32>
    %217 = vector.broadcast %216 : vector<1x128xf32> to vector<8x128xf32>
    %218 = arith.addf %215, %217 : vector<8x128xf32>
    %cst_74 = arith.constant 0.000000e+00 : f32
    %219 = vector.broadcast %cst_74 : f32 to vector<8x128xf32>
    %220 = arith.maximumf %218, %219 : vector<8x128xf32>
    %221 = tpu.iota {dimensions = array<i32: 1>} : vector<8x128xi32>
    %c32_i32 = arith.constant 32 : i32
    %222 = vector.broadcast %c32_i32 : i32 to vector<8x128xi32>
    %223 = arith.cmpi slt, %221, %222 : vector<8x128xi32>
    %cst_75 = arith.constant dense<0xFF800000> : vector<8xf32>
    %224 = vector.multi_reduction <maximumf>, %220, %cst_75 [1] : vector<8x128xf32> to vector<8xf32>
    %225 = vector.shape_cast %224 : vector<8xf32> to vector<8x1xf32>
    %226 = vector.broadcast %225 : vector<8x1xf32> to vector<8x128xf32>
    %227 = arith.subf %220, %226 : vector<8x128xf32>
    %228 = math.exp %227 : vector<8x128xf32>
    %cst_76 = arith.constant 0.000000e+00 : f32
    %229 = vector.broadcast %cst_76 : f32 to vector<8x128xf32>
    %230 = arith.select %223, %228, %229 : vector<8x128xi1>, vector<8x128xf32>
    %cst_77 = arith.constant dense<0.000000e+00> : vector<8xf32>
    %231 = vector.multi_reduction <add>, %230, %cst_77 [1] : vector<8x128xf32> to vector<8xf32>
    %232 = vector.shape_cast %231 : vector<8xf32> to vector<8x1xf32>
    %233 = math.log %232 : vector<8x1xf32>
    %234 = vector.broadcast %225 : vector<8x1xf32> to vector<8x128xf32>
    %235 = arith.subf %220, %234 : vector<8x128xf32>
    %236 = vector.broadcast %233 : vector<8x1xf32> to vector<8x128xf32>
    %237 = arith.subf %235, %236 : vector<8x128xf32>
    %c0_78 = arith.constant 0 : index
    %c0_79 = arith.constant 0 : index
    %238 = vector.load %arg9[%c0_78, %c0_79] : memref<8x128xf32, #tpu.memory_space<vmem>>, vector<8x128xf32>
    tpu.vector_store %arg9[%c0_78, %c0_79], %237 {strides = array<i32>} : memref<8x128xf32, #tpu.memory_space<vmem>>, vector<8x128xf32>,
    return
  }
  func.func @transform_0(%arg0: i32) -> (i32, i32) {
    %c0_i32 = arith.constant 0 : i32
    %c0_i32_0 = arith.constant 0 : i32
    %c0_i32_1 = arith.constant 0 : i32
    return %c0_i32, %c0_i32_0 : i32, i32
  }
  func.func @transform_1(%arg0: i32) -> (i32, i32) {
    %c0_i32 = arith.constant 0 : i32
    %c0_i32_0 = arith.constant 0 : i32
    %c0_i32_1 = arith.constant 0 : i32
    return %c0_i32, %c0_i32_0 : i32, i32
  }
  func.func @transform_2(%arg0: i32) -> (i32, i32) {
    %c0_i32 = arith.constant 0 : i32
    %c0_i32_0 = arith.constant 0 : i32
    %c0_i32_1 = arith.constant 0 : i32
    return %c0_i32, %c0_i32_0 : i32, i32
  }
  func.func @transform_3(%arg0: i32) -> (i32, i32) {
    %c0_i32 = arith.constant 0 : i32
    %c0_i32_0 = arith.constant 0 : i32
    %c0_i32_1 = arith.constant 0 : i32
    return %c0_i32, %c0_i32_0 : i32, i32
  }
  func.func @transform_4(%arg0: i32) -> (i32, i32) {
    %c0_i32 = arith.constant 0 : i32
    %c0_i32_0 = arith.constant 0 : i32
    %c0_i32_1 = arith.constant 0 : i32
    return %c0_i32, %c0_i32_0 : i32, i32
  }
  func.func @transform_5(%arg0: i32) -> (i32, i32) {
    %c0_i32 = arith.constant 0 : i32
    %c0_i32_0 = arith.constant 0 : i32
    %c0_i32_1 = arith.constant 0 : i32
    return %c0_i32, %c0_i32_0 : i32, i32
  }
  func.func @transform_8(%arg0: i32) -> (i32, i32) {
    %c0_i32 = arith.constant 0 : i32
    %c0_i32_0 = arith.constant 0 : i32
    %c0_i32_1 = arith.constant 0 : i32
    return %c0_i32, %c0_i32_0 : i32, i32
  }
  func.func @transform_9(%arg0: i32) -> (i32, i32) {
    %c0_i32 = arith.constant 0 : i32
    %c0_i32_0 = arith.constant 0 : i32
    %c0_i32_1 = arith.constant 0 : i32
    return %c0_i32, %c0_i32_0 : i32, i32
  }
  func.func @transform_10(%arg0: i32) -> (i32, i32) {
    %c0_i32 = arith.constant 0 : i32
    %c0_i32_0 = arith.constant 0 : i32
    %c0_i32_1 = arith.constant 0 : i32
    return %c0_i32, %c0_i32_0 : i32, i32
  }
}

</mosaic_0001>

<bundles_post_ra>
// kernel: rnn_forward.1
= control target key start
LH: loop header
LB: loop body
LE: loop exit
PB: predicated region body
PF: predicated region fallthrough
CT: control target
= control target key end

     0   :  { %16 = vsyncpa [#allocation8], 0  ;;  %s4200_s0 = inlined_call_operand.vmem [shape: f32[8,16], index: 0, kind: input, shape index: {}]   ;;  %s4201_s1 = inlined_call_operand.vmem [shape: bf16[16,512], index: 1, kind: input, shape index: {}]   ;;  %s4202_s2 = inlined_call_operand.hbm [shape: bf16[128,512], index: 2, kind: input, shape index: {}]   ;;  %s4203_s3 = inlined_call_operand.vmem [shape: f32[1,512], index: 3, kind: input, shape index: {}]   ;;  %s4204_s4 = inlined_call_operand.vmem [shape: f32[1,128], index: 4, kind: input, shape index: {}]   ;;  %s4205_s5 = inlined_call_operand.vmem [shape: f32[1,128], index: 5, kind: input, shape index: {}]   ;;  %s4206_s6 = inlined_call_operand.vmem [shape: bf16[128,128], index: 6, kind: input, shape index: {}]   ;;  %s4207_s7 = inlined_call_operand.vmem [shape: f32[1,128], index: 7, kind: input, shape index: {}]   ;;  %s4208_s8 = inlined_call_operand.hbm [shape: f32[8,128], index: 8, kind: output, shape index: {0}]   ;;  %s4209_s9 = inlined_call_operand.vmem [shape: f32[1,128], index: 9, kind: output, shape index: {1}]   ;;  %s4210_s10 = inlined_call_operand.vmem [shape: f32[1,128], index: 10, kind: output, shape index: {2}]  }
   0x1   :  { %17 = vsyncpa [#allocation9], 0  ;;  %s3576_s13 = smov [#allocation7]   ;;  %s3524_s17 = scalar_lea.hbm %s4202_s2, 4096 }
   0x2   :  { %s27_s14 = sshll.u32 %s3576_s13, 4  ;;  %p3525_p0 = scmp.ne.s32.totalorder %s4202_s2, %s3524_s17  ;;  %s28_s14 = int_to_ptr.vmem [resolvable:$true] %s27_s14 }
   0x3   :  { %p3528_p1 = scmp.lt.u32.totalorder %s3524_s17, %s4202_s2 }
   0x5   :  { %p3530_p2 = pnand %p3528_p1, %p3525_p0 }
   0x7   :  { %3533 = shalt.err (!%p3530_p2)
}
   0x8   :  { %s3534_s22 = scalar_lea.vmem %s28_s14, 4096  ;;  %p3539_p4 = scmp.lt.s32.totalorder %s28_s14, %s28_s14 }
   0x9   :  { %p3535_p3 = scmp.ne.s32.totalorder %s28_s14, %s3534_s22  ;;  %p3540_p5 = scmp.lt.s32.totalorder %s3534_s22, %s3534_s22 }
   0xb   :  { %p3541_p6 = por %p3540_p5, %p3539_p4 }
   0xd   :  { %p3542_p7 = pnand %p3541_p6, %p3535_p3 }
   0xf   :  { %3545 = shalt.err (!%p3542_p7)
}
  0x10   :  { %s3577_s23 = smov 256   ;;  %s3578_s24 = smov 16  }
  0x11   :  { %33 = dma.hbm_to_vmem [thread:$0]  %s4202_s2, 4096, %s28_s14, [#allocation8], %s3577_s23, %s3577_s23, %s3578_s24  }
  0x12   :  { %3568 = dma.done.wait [#allocation8], 4096  }
  0x13   :  { %3569 = vsyncadd [#allocation8], 4294963200  ;;  %v3654_v0 = vld [vmem:[%s4206_s6] sm:$0xff]  ;;  %v3659_v1 = vld [vmem:[%s4206_s6 + $0x8] sm:$0xff] }
  0x14   :  { %v3664_v2 = vld [vmem:[%s4206_s6 + $0x10] sm:$0xff]  ;;  %v3669_v3 = vld [vmem:[%s4206_s6 + $0x18] sm:$0xff]  ;;  %v3674_v4 = vld [vmem:[%s4206_s6 + $0x20] sm:$0xff] }
  0x15   :  { %v3679_v5 = vld [vmem:[%s4206_s6 + $0x28] sm:$0xff]  ;;  %v3684_v6 = vld [vmem:[%s4206_s6 + $0x30] sm:$0xff]  ;;  %v3689_v7 = vld [vmem:[%s4206_s6 + $0x38] sm:$0xff] }
  0x16   :  { %99 = vsyncadd [#allocation6], 1024  ;;  %v118_v8 = vld [vmem:[%s4207_s7] sm:$0x1] }
  0x17   :  { %119 = vst [vmem:[#allocation5] sm:$0x1] %v118_v8 }
  0x18   :  { %144 = vsyncadd [#allocation6 + $0x1], 16  ;;  %v3354_v9 = vld [vmem:[%s4201_s1 + $0x4] ss:$16 sps:$4 sm:$0xff]   ;;  %v3356_v10 = vld [vmem:[%s4201_s1] ss:$16 sps:$4 sm:$0xff]   ;;  %v153_v50 = vlaneseq }
  0x19   :  { %v3579_v11 = vmov 0   ;;  %v145_v12 = vld [vmem:[%s4200_s0] sm:$0xff]  ;;  %v3357_v13 = vld [vmem:[%s4201_s1 + $0x8] ss:$16 sps:$4 sm:$0xff]   ;;  %197 = vmatprep.subr.bf16.mxu1 %v3354_v9  ;;  %v3359_v15 = vld [vmem:[%s4201_s1 + $0xc] ss:$16 sps:$4 sm:$0xff]  }
  0x1a   :  { %229 = vmatprep.mubr.bf16.mxu1 %v3579_v11  ;;  %511 = vmatprep.mubr.bf16.mxu0 %v3579_v11  ;;  %v146_v14 = vpack.c.bf16 %v145_v12, %v145_v12  ;;  %vm193_vm0 = vcmask 130048   ;;  %v3711_v16 = vld [vmem:[#allocation7 + $0x4] ss:$16 sps:$4 sm:$0xff]   ;;  %v3713_v17 = vld [vmem:[#allocation7] ss:$16 sps:$4 sm:$0xff]   ;;  %v154_v51 = vshrl.u32 %v153_v50, 7 }
  0x1b   :  { %198 = vmatpush1.bf16.msra.mxu1 %v3356_v10  ;;  %v3715_v18 = vld [vmem:[#allocation7 + $0xc] ss:$16 sps:$4 sm:$0xff]   ;;  %479 = vmatprep.subr.bf16.mxu0 %v3711_v16  ;;  %v3718_v19 = vld [vmem:[#allocation7 + $0x24] ss:$16 sps:$4 sm:$0xff]   ;;  %v3722_v20 = vld [vmem:[#allocation7 + $0x20] ss:$16 sps:$4 sm:$0xff]  }
  0x1c   :  { %238 = vmatprep.subr.bf16.mxu1 %v3359_v15  ;;  %480 = vmatpush1.bf16.msra.mxu0 %v3713_v17  ;;  %v3727_v21 = vld [vmem:[#allocation7 + $0x44] ss:$16 sps:$4 sm:$0xff]   ;;  %v3730_v22 = vld [vmem:[#allocation7 + $0x40] ss:$16 sps:$4 sm:$0xff]   ;;  %v3732_v23 = vld [vmem:[#allocation7 + $0x8] ss:$16 sps:$4 sm:$0xff]  }
  0x1d   :  { %481 = vmatprep.subr.bf16.mxu0 %v3718_v19  ;;  %v3735_v24 = vld [vmem:[#allocation7 + $0x64] ss:$16 sps:$4 sm:$0xff]   ;;  %v3737_v25 = vld [vmem:[#allocation7 + $0x2c] ss:$16 sps:$4 sm:$0xff]   ;;  %v3741_v26 = vld [vmem:[#allocation7 + $0x60] ss:$16 sps:$4 sm:$0xff]  }
  0x1e   :  { %3048 = vmatmul.mubr.msk.bf16.vlgmr.msra.gmra.mrb[0].mxu1 %vm193_vm0, %v146_v14  ;;  %v3744_v27 = vld [vmem:[#allocation7 + $0x28] ss:$16 sps:$4 sm:$0xff]   ;;  %v3747_v28 = vld [vmem:[#allocation7 + $0x84] ss:$16 sps:$4 sm:$0xff]   ;;  %v3750_v29 = vld [vmem:[#allocation7 + $0x4c] ss:$16 sps:$4 sm:$0xff]  }
  0x1f   :  { %239 = vmatpush1.bf16.msra.mxu1 %v3357_v13  ;;  %270 = vmatprep.mubr.bf16.mxu1 %v3579_v11  ;;  %v3754_v30 = vld [vmem:[#allocation7 + $0x80] ss:$16 sps:$4 sm:$0xff]   ;;  %v3757_v31 = vld [vmem:[#allocation7 + $0x48] ss:$16 sps:$4 sm:$0xff]   ;;  %v3760_v32 = vld [vmem:[#allocation7 + $0xa4] ss:$16 sps:$4 sm:$0xff]  }
  0x20   :  { %520 = vmatprep.subr.bf16.mxu1 %v3715_v18  ;;  %482 = vmatpush1.bf16.msra.mxu0 %v3722_v20  ;;  %v3763_v33 = vld [vmem:[#allocation7 + $0x6c] ss:$16 sps:$4 sm:$0xff]   ;;  %v3766_v34 = vld [vmem:[#allocation7 + $0xa0] ss:$16 sps:$4 sm:$0xff]   ;;  %v3769_v35 = vld [vmem:[#allocation7 + $0x68] ss:$16 sps:$4 sm:$0xff]  }
  0x21   :  { %483 = vmatprep.subr.bf16.mxu0 %v3727_v21  ;;  %v3771_v36 = vld [vmem:[#allocation7 + $0x8c] ss:$16 sps:$4 sm:$0xff]   ;;  %v3774_v37 = vld [vmem:[#allocation7 + $0xc4] ss:$16 sps:$4 sm:$0xff]   ;;  %v3777_v38 = vld [vmem:[#allocation7 + $0xc0] ss:$16 sps:$4 sm:$0xff]  }
  0x22   :  { %v3779_v39 = vld [vmem:[#allocation7 + $0x88] ss:$16 sps:$4 sm:$0xff]   ;;  %v3781_v40 = vld [vmem:[#allocation7 + $0xe4] ss:$16 sps:$4 sm:$0xff]   ;;  %v3784_v41 = vld [vmem:[#allocation7 + $0xac] ss:$16 sps:$4 sm:$0xff]  }
  0x23   :  { %v3789_v42 = vld [vmem:[#allocation7 + $0xe0] ss:$16 sps:$4 sm:$0xff]   ;;  %v283_v43 = vld [vmem:[%s4204_s4] sm:$0x1]  ;;  %v3794_v44 = vld [vmem:[#allocation7 + $0xa8] ss:$16 sps:$4 sm:$0xff]  }
  0x24   :  { %484 = vmatpush1.bf16.msra.mxu0 %v3730_v22  ;;  %v3797_v45 = vld [vmem:[#allocation7 + $0xcc] ss:$16 sps:$4 sm:$0xff]   ;;  %v286_v46 = vpack.c.bf16 %v283_v43, %v283_v43  ;;  %v3804_v47 = vld [vmem:[#allocation7 + $0xc8] ss:$16 sps:$4 sm:$0xff]   ;;  %v155_v52 = vsub.s32 0, %v154_v51  ;;  %v159_v54 = vsub.s32 1, %v154_v51 }
  0x25   :  { %485 = vmatprep.subr.bf16.mxu0 %v3735_v24  ;;  %v3808_v48 = vld [vmem:[#allocation7 + $0xec] ss:$16 sps:$4 sm:$0xff]   ;;  %v3813_v49 = vld [vmem:[#allocation7 + $0xe8] ss:$16 sps:$4 sm:$0xff]   ;;  %v163_v60 = vsub.s32 2, %v154_v51  ;;  %v167_v63 = vsub.s32 3, %v154_v51 }
  0x26   :  { %3049 = vmatmul.mubr.msk.bf16.vlgmr.msra.gmra.mrb[4].mxu1 %vm193_vm0, %v146_v14  ;;  %v151_v53 = vld [vmem:[%s4203_s3] sm:$0xf] }
  0x27   :  { %521 = vmatpush1.bf16.msra.mxu1 %v3732_v23  ;;  %552 = vmatprep.mubr.bf16.mxu1 %v3579_v11  ;;  %v156_v55 = vrot.slane %v151_v53, %v155_v52  ;;  %v160_v56 = vrot.slane %v151_v53, %v159_v54  ;;  %v164_v9 = vrot.slane %v151_v53, %v163_v60  ;;  %v3580_v52 = vmov 1966171168  }
  0x28   :  { %522 = vmatprep.subr.bf16.mxu1 %v3737_v25  ;;  %486 = vmatpush1.bf16.msra.mxu0 %v3741_v26  ;;  %v168_v10 = vrot.slane %v151_v53, %v167_v63  ;;  %v568_v54 = vunpack.c.l.s4 %v3580_v52 }
  0x29   :  { %487 = vmatprep.subr.bf16.mxu0 %v3747_v28 }
  0x2b   :  { %523 = vmatpush1.bf16.msra.mxu1 %v3744_v27 }
  0x2c   :  { %524 = vmatprep.subr.bf16.mxu1 %v3750_v29  ;;  %488 = vmatpush1.bf16.msra.mxu0 %v3754_v30 }
  0x2d   :  { %489 = vmatprep.subr.bf16.mxu0 %v3760_v32 }
  0x2f   :  { %525 = vmatpush1.bf16.msra.mxu1 %v3757_v31 }
  0x30   :  { %526 = vmatprep.subr.bf16.mxu1 %v3763_v33  ;;  %490 = vmatpush1.bf16.msra.mxu0 %v3766_v34 }
  0x31   :  { %491 = vmatprep.subr.bf16.mxu0 %v3774_v37 }
  0x33   :  { %527 = vmatpush1.bf16.msra.mxu1 %v3769_v35 }
  0x34   :  { %528 = vmatprep.subr.bf16.mxu1 %v3771_v36  ;;  %492 = vmatpush1.bf16.msra.mxu0 %v3777_v38 }
  0x35   :  { %493 = vmatprep.subr.bf16.mxu0 %v3781_v40 }
  0x37   :  { %529 = vmatpush1.bf16.msra.mxu1 %v3779_v39 }
  0x38   :  { %530 = vmatprep.subr.bf16.mxu1 %v3784_v41  ;;  %494 = vmatpush1.bf16.msra.mxu0 %v3789_v42 }
  0x39   :  { %807 = vmatprep.subr.bf16.mxu0 %v3711_v16 }
  0x3b   :  { %531 = vmatpush1.bf16.msra.mxu1 %v3794_v44  ;;  %512 = vmatmul.mubr.bf16.vlgmr.msra.gmra.mrb[0].mxu0 %v286_v46 }
  0x3c   :  { %532 = vmatprep.subr.bf16.mxu1 %v3797_v45  ;;  %808 = vmatpush1.bf16.msra.mxu0 %v3713_v17 }
  0x3d   :  { %839 = vmatprep.mubr.bf16.mxu0 %v3579_v11  ;;  %809 = vmatprep.subr.bf16.mxu0 %v3718_v19 }
  0x3f   :  { %533 = vmatpush1.bf16.msra.mxu1 %v3804_v47 }
  0x40   :  { %534 = vmatprep.subr.bf16.mxu1 %v3808_v48  ;;  %810 = vmatpush1.bf16.msra.mxu0 %v3722_v20 }
  0x41   :  { %811 = vmatprep.subr.bf16.mxu0 %v3727_v21 }
  0x43   :  { %535 = vmatpush1.bf16.msra.mxu1 %v3813_v49 }
  0x44   :  { %848 = vmatprep.subr.bf16.mxu1 %v3715_v18  ;;  %812 = vmatpush1.bf16.msra.mxu0 %v3730_v22 }
  0x45   :  { %813 = vmatprep.subr.bf16.mxu0 %v3735_v24 }
  0x46   :  { %553 = vmatmul.mubr.bf16.vlgmr.msra.gmra.mrb[8].mxu1 %v286_v46 }
  0x47   :  { %849 = vmatpush1.bf16.msra.mxu1 %v3732_v23  ;;  %880 = vmatprep.mubr.bf16.mxu1 %v3579_v11 }
  0x48   :  { %850 = vmatprep.subr.bf16.mxu1 %v3737_v25  ;;  %814 = vmatpush1.bf16.msra.mxu0 %v3741_v26 }
  0x49   :  { %815 = vmatprep.subr.bf16.mxu0 %v3747_v28 }
  0x4b   :  { %851 = vmatpush1.bf16.msra.mxu1 %v3744_v27 }
  0x4c   :  { %852 = vmatprep.subr.bf16.mxu1 %v3750_v29  ;;  %816 = vmatpush1.bf16.msra.mxu0 %v3754_v30 }
  0x4d   :  { %817 = vmatprep.subr.bf16.mxu0 %v3760_v32 }
  0x4f   :  { %853 = vmatpush1.bf16.msra.mxu1 %v3757_v31 }
  0x50   :  { %854 = vmatprep.subr.bf16.mxu1 %v3763_v33  ;;  %818 = vmatpush1.bf16.msra.mxu0 %v3766_v34 }
  0x51   :  { %819 = vmatprep.subr.bf16.mxu0 %v3774_v37 }
  0x53   :  { %855 = vmatpush1.bf16.msra.mxu1 %v3769_v35 }
  0x54   :  { %856 = vmatprep.subr.bf16.mxu1 %v3771_v36  ;;  %820 = vmatpush1.bf16.msra.mxu0 %v3777_v38 }
  0x55   :  { %821 = vmatprep.subr.bf16.mxu0 %v3781_v40 }
  0x57   :  { %857 = vmatpush1.bf16.msra.mxu1 %v3779_v39 }
  0x58   :  { %858 = vmatprep.subr.bf16.mxu1 %v3784_v41  ;;  %822 = vmatpush1.bf16.msra.mxu0 %v3789_v42 }
  0x59   :  { %1135 = vmatprep.subr.bf16.mxu0 %v3711_v16 }
  0x5b   :  { %859 = vmatpush1.bf16.msra.mxu1 %v3794_v44 }
  0x5c   :  { %860 = vmatprep.subr.bf16.mxu1 %v3797_v45 }
  0x5f   :  { %861 = vmatpush1.bf16.msra.mxu1 %v3804_v47 }
  0x60   :  { %862 = vmatprep.subr.bf16.mxu1 %v3808_v48 }
  0x63   :  { %863 = vmatpush1.bf16.msra.mxu1 %v3813_v49 }
  0x64   :  { %1176 = vmatprep.subr.bf16.mxu1 %v3715_v18 }
  0xf1   :  { %v231_v57 = vpop.f32.mrb[0].mxu1 }
  0xf2   :  { %v232_v58 = vadd.f32 %v231_v57, %v156_v55  ;;  %v233_v59 = vpop.f32.mrb[1].mxu1 }
  0xf3   :  { %v234_v61 = vadd.f32 %v233_v59, %v160_v56  ;;  %v235_v62 = vpop.f32.mrb[2].mxu1 }
  0xf4   :  { %279 = vst [vmem:[#allocation2] sm:$0xff] %v232_v58  ;;  %v236_v8 = vpop.f32.mrb[3].mxu1  ;;  %v569_v62 = vunpack.c.0.s8 %v568_v54 }
  0xf5   :  { %280 = vst [vmem:[#allocation2 + $0x8] sm:$0xff] %v234_v61 }
  0xf6   :  { %v3854_v8 = vsub.s32 %v569_v62, %v154_v51 }
  0xf9   :  { %v272_v12 = vpop.f32.mrb[4].mxu1 }
  0xfa   :  { %v273_v13 = vadd.f32 %v272_v12, %v164_v9  ;;  %v274_v14 = vpop.f32.mrb[5].mxu1 }
  0xfb   :  { %v275_v15 = vadd.f32 %v274_v14, %v168_v10  ;;  %v276_v43 = vpop.f32.mrb[6].mxu1 }
  0xfc   :  { %281 = vst [vmem:[#allocation2 + $0x10] sm:$0xff] %v273_v13  ;;  %v277_v46 = vpop.f32.mrb[7].mxu1 }
  0xfd   :  { %282 = vst [vmem:[#allocation2 + $0x18] sm:$0xff] %v275_v15 }
 0x104   :  { %v285_v15 = vld [vmem:[#allocation2] ss:$8 sm:$0xf] }
 0x10e   :  { %v513_v55 = vpop.f32.mrb[0].mxu0 }
 0x10f   :  { %v515_v57 = vpop.f32.mrb[1].mxu0 }
 0x110   :  { %v565_v56 = vcombine.low %v513_v55, %v515_v57  ;;  %v517_v59 = vpop.f32.mrb[2].mxu0  ;;  %v284_v57 = vld [vmem:[%s4205_s5] sm:$0x1] }
 0x111   :  { %v518_v58 = vpop.f32.mrb[3].mxu0 }
 0x112   :  { %v573_v61 = vrot.slane %v565_v56, %v3854_v8 }
 0x119   :  { %v554_v60 = vpop.f32.mrb[8].mxu1 }
 0x11a   :  { %v556_v53 = vpop.f32.mrb[9].mxu1 }
 0x11b   :  { %v566_v63 = vcombine.low %v554_v60, %v556_v53  ;;  %v558_v9 = vpop.f32.mrb[10].mxu1 }
 0x11c   :  { %v559_v10 = vpop.f32.mrb[11].mxu1 }
 0x11d   :  { %v580_v12 = vrot.slane %v566_v63, %v3854_v8 }
 0x11f   :  { %v581_v13 = vcombine.low %v573_v61, %v580_v12 }
 0x121   :  { %v588_v14 = vrot.slane %v581_v13, %v3854_v8 }
 0x123   :  { %v590_v43 = vadd.f32 %v588_v14, %v285_v15 }
 0x125   :  { %v3082_v46 = vmul.f32 -1.442695, %v590_v43  ;;  %v598_v51 = vrot.slane %v590_v43, 3 }
 0x127   :  { %3456 = vpow2.f32 %v3082_v46 }
 0x131   :  { %v3457_v52 = vpop.eup %3456 }
 0x132   :  { %v594_v54 = vadd.f32 1.0, %v3457_v52 }
 0x134   :  { %3458 = vrcp.f32 %v594_v54 }
 0x135   :  { %3460 = vtanh.f32 %v598_v51 }
 0x13e   :  { %v3459_v55 = vpop.eup %3458 }
 0x13f   :  { %v602_v56 = vrot.slane %v3459_v55, 1  ;;  %v3461_v59 = vpop.eup %3460  ;;  %v608_v53 = vrot.slane %v3459_v55, 2 }
 0x140   :  { %v605_v62 = vmul.f32 %v3461_v59, %v3459_v55 }
 0x141   :  { %v604_v58 = vmul.f32 %v602_v56, %v284_v57 }
 0x143   :  { %v3862_v60 = vadd.f32 %v605_v62, %v604_v58 }
 0x145   :  { %3462 = vtanh.f32 %v3862_v60 }
 0x14f   :  { %v3463_v61 = vpop.eup %3462 }
 0x150   :  { %v610_v63 = vmul.f32 %v3463_v61, %v608_v53 }
 0x152   :  { %611 = vst [vmem:[#allocation3] sm:$0x1] %v610_v63  ;;  %v614_v9 = vpack.c.bf16 %v610_v63, %v610_v63 }
 0x154   :  { %840 = vmatmul.mubr.bf16.vlgmr.msra.gmra.mrb[4].mxu0 %v614_v9  ;;  %881 = vmatmul.mubr.bf16.vlgmr.msra.gmra.mrb[12].mxu1 %v614_v9 }
 0x155   :  { %1136 = vmatpush1.bf16.msra.mxu0 %v3713_v17  ;;  %1177 = vmatpush1.bf16.msra.mxu1 %v3732_v23 }
 0x156   :  { %1137 = vmatprep.subr.bf16.mxu0 %v3718_v19  ;;  %1178 = vmatprep.subr.bf16.mxu1 %v3737_v25 }
 0x157   :  { %1167 = vmatprep.mubr.bf16.mxu0 %v3579_v11  ;;  %1208 = vmatprep.mubr.bf16.mxu1 %v3579_v11 }
 0x159   :  { %1138 = vmatpush1.bf16.msra.mxu0 %v3722_v20  ;;  %1179 = vmatpush1.bf16.msra.mxu1 %v3744_v27 }
 0x15a   :  { %1139 = vmatprep.subr.bf16.mxu0 %v3727_v21  ;;  %1180 = vmatprep.subr.bf16.mxu1 %v3750_v29 }
 0x15d   :  { %1140 = vmatpush1.bf16.msra.mxu0 %v3730_v22  ;;  %1181 = vmatpush1.bf16.msra.mxu1 %v3757_v31 }
 0x15e   :  { %1141 = vmatprep.subr.bf16.mxu0 %v3735_v24  ;;  %1182 = vmatprep.subr.bf16.mxu1 %v3763_v33 }
 0x161   :  { %1142 = vmatpush1.bf16.msra.mxu0 %v3741_v26  ;;  %1183 = vmatpush1.bf16.msra.mxu1 %v3769_v35 }
 0x162   :  { %1143 = vmatprep.subr.bf16.mxu0 %v3747_v28  ;;  %1184 = vmatprep.subr.bf16.mxu1 %v3771_v36 }
 0x165   :  { %1144 = vmatpush1.bf16.msra.mxu0 %v3754_v30  ;;  %1185 = vmatpush1.bf16.msra.mxu1 %v3779_v39 }
 0x166   :  { %1145 = vmatprep.subr.bf16.mxu0 %v3760_v32  ;;  %1186 = vmatprep.subr.bf16.mxu1 %v3784_v41 }
 0x169   :  { %1146 = vmatpush1.bf16.msra.mxu0 %v3766_v34  ;;  %1187 = vmatpush1.bf16.msra.mxu1 %v3794_v44 }
 0x16a   :  { %1147 = vmatprep.subr.bf16.mxu0 %v3774_v37  ;;  %1188 = vmatprep.subr.bf16.mxu1 %v3797_v45 }
 0x16d   :  { %1148 = vmatpush1.bf16.msra.mxu0 %v3777_v38  ;;  %1189 = vmatpush1.bf16.msra.mxu1 %v3804_v47 }
 0x16e   :  { %1149 = vmatprep.subr.bf16.mxu0 %v3781_v40  ;;  %1190 = vmatprep.subr.bf16.mxu1 %v3808_v48 }
 0x171   :  { %1150 = vmatpush1.bf16.msra.mxu0 %v3789_v42  ;;  %1191 = vmatpush1.bf16.msra.mxu1 %v3813_v49 }
 0x172   :  { %1463 = vmatprep.subr.bf16.mxu0 %v3711_v16  ;;  %1504 = vmatprep.subr.bf16.mxu1 %v3715_v18  ;;  %v613_v16 = vld [vmem:[#allocation2 + $0x1] ss:$8 sm:$0xf] }
 0x227   :  { %v841_v10 = vpop.f32.mrb[4].mxu0  ;;  %v882_v12 = vpop.f32.mrb[12].mxu1 }
 0x228   :  { %v843_v13 = vpop.f32.mrb[5].mxu0  ;;  %v884_v14 = vpop.f32.mrb[13].mxu1 }
 0x229   :  { %v893_v15 = vcombine.low %v841_v10, %v843_v13  ;;  %v894_v43 = vcombine.low %v882_v12, %v884_v14  ;;  %v845_v46 = vpop.f32.mrb[6].mxu0  ;;  %v886_v52 = vpop.f32.mrb[14].mxu1 }
 0x22a   :  { %v846_v54 = vpop.f32.mrb[7].mxu0  ;;  %v887_v51 = vpop.f32.mrb[15].mxu1 }
 0x22b   :  { %v901_v55 = vrot.slane %v893_v15, %v3854_v8  ;;  %v908_v57 = vrot.slane %v894_v43, %v3854_v8  ;;  %v3949_v54 = vld [vmem:[#allocation7 + $0xc] ss:$16 sps:$4 sm:$0xff]   ;;  %v3951_v51 = vld [vmem:[#allocation7] ss:$16 sps:$4 sm:$0xff]  }
 0x22d   :  { %v909_v56 = vcombine.low %v901_v55, %v908_v57  ;;  %v3953_v55 = vld [vmem:[#allocation7 + $0x8] ss:$16 sps:$4 sm:$0xff]   ;;  %v3959_v57 = vld [vmem:[#allocation7 + $0x24] ss:$16 sps:$4 sm:$0xff]  }
 0x22f   :  { %v916_v59 = vrot.slane %v909_v56, %v3854_v8  ;;  %v3961_v56 = vld [vmem:[#allocation7 + $0x2c] ss:$16 sps:$4 sm:$0xff]  }
 0x231   :  { %v918_v62 = vadd.f32 %v916_v59, %v613_v16  ;;  %v3963_v59 = vld [vmem:[#allocation7 + $0x20] ss:$16 sps:$4 sm:$0xff]   ;;  %v3965_v16 = vld [vmem:[#allocation7 + $0x28] ss:$16 sps:$4 sm:$0xff]  }
 0x233   :  { %v3115_v18 = vmul.f32 -1.442695, %v918_v62  ;;  %v926_v61 = vrot.slane %v918_v62, 3  ;;  %v3971_v62 = vld [vmem:[#allocation7 + $0x44] ss:$16 sps:$4 sm:$0xff]  }
 0x235   :  { %3464 = vpow2.f32 %v3115_v18  ;;  %v3973_v18 = vld [vmem:[#allocation7 + $0x4c] ss:$16 sps:$4 sm:$0xff]  }
 0x23f   :  { %v3465_v58 = vpop.eup %3464 }
 0x240   :  { %v922_v53 = vadd.f32 1.0, %v3465_v58  ;;  %v3975_v58 = vld [vmem:[#allocation7 + $0x40] ss:$16 sps:$4 sm:$0xff]  }
 0x242   :  { %3466 = vrcp.f32 %v922_v53  ;;  %v3977_v53 = vld [vmem:[#allocation7 + $0x48] ss:$16 sps:$4 sm:$0xff]  }
 0x243   :  { %3468 = vtanh.f32 %v926_v61  ;;  %v3983_v61 = vld [vmem:[#allocation7 + $0x60] ss:$16 sps:$4 sm:$0xff]  }
 0x24c   :  { %v3467_v63 = vpop.eup %3466 }
 0x24d   :  { %v930_v9 = vrot.slane %v3467_v63, 1  ;;  %v3469_v10 = vpop.eup %3468  ;;  %v936_v15 = vrot.slane %v3467_v63, 2 }
 0x24e   :  { %v933_v12 = vmul.f32 %v3469_v10, %v3467_v63  ;;  %v3985_v63 = vld [vmem:[#allocation7 + $0x64] ss:$16 sps:$4 sm:$0xff]   ;;  %v3989_v10 = vld [vmem:[#allocation7 + $0x6c] ss:$16 sps:$4 sm:$0xff]  }
 0x24f   :  { %v932_v13 = vmul.f32 %v930_v9, %v3862_v60  ;;  %v3947_v60 = vld [vmem:[#allocation7 + $0x4] ss:$16 sps:$4 sm:$0xff]   ;;  %v3987_v9 = vld [vmem:[#allocation7 + $0x68] ss:$16 sps:$4 sm:$0xff]  }
 0x251   :  { %v3903_v14 = vadd.f32 %v933_v12, %v932_v13  ;;  %v3991_v12 = vld [vmem:[#allocation7 + $0x84] ss:$16 sps:$4 sm:$0xff]   ;;  %v3994_v13 = vld [vmem:[#allocation7 + $0x8c] ss:$16 sps:$4 sm:$0xff]  }
 0x253   :  { %3470 = vtanh.f32 %v3903_v14 }
 0x25d   :  { %v3471_v43 = vpop.eup %3470 }
 0x25e   :  { %v938_v46 = vmul.f32 %v3471_v43, %v936_v15  ;;  %v4002_v15 = vld [vmem:[#allocation7 + $0x88] ss:$16 sps:$4 sm:$0xff]   ;;  %v4004_v43 = vld [vmem:[#allocation7 + $0xa4] ss:$16 sps:$4 sm:$0xff]  }
 0x260   :  { %939 = vst [vmem:[#allocation3 + $0x1] sm:$0x1] %v938_v46  ;;  %v942_v52 = vpack.c.bf16 %v938_v46, %v938_v46  ;;  %v4007_v46 = vld [vmem:[#allocation7 + $0xac] ss:$16 sps:$4 sm:$0xff]  }
 0x262   :  { %1168 = vmatmul.mubr.bf16.vlgmr.msra.gmra.mrb[8].mxu0 %v942_v52  ;;  %1209 = vmatmul.mubr.bf16.vlgmr.msra.gmra.mrb[16].mxu1 %v942_v52  ;;  %v4010_v52 = vld [vmem:[#allocation7 + $0xa0] ss:$16 sps:$4 sm:$0xff]  }
 0x263   :  { %1464 = vmatpush1.bf16.msra.mxu0 %v3713_v17  ;;  %1505 = vmatpush1.bf16.msra.mxu1 %v3732_v23 }
 0x264   :  { %1465 = vmatprep.subr.bf16.mxu0 %v3718_v19  ;;  %1506 = vmatprep.subr.bf16.mxu1 %v3737_v25 }
 0x265   :  { %1495 = vmatprep.mubr.bf16.mxu0 %v3579_v11  ;;  %1536 = vmatprep.mubr.bf16.mxu1 %v3579_v11 }
 0x267   :  { %1466 = vmatpush1.bf16.msra.mxu0 %v3722_v20  ;;  %1507 = vmatpush1.bf16.msra.mxu1 %v3744_v27 }
 0x268   :  { %1467 = vmatprep.subr.bf16.mxu0 %v3727_v21  ;;  %1508 = vmatprep.subr.bf16.mxu1 %v3750_v29 }
 0x26b   :  { %1468 = vmatpush1.bf16.msra.mxu0 %v3730_v22  ;;  %1509 = vmatpush1.bf16.msra.mxu1 %v3757_v31 }
 0x26c   :  { %1469 = vmatprep.subr.bf16.mxu0 %v3735_v24  ;;  %1510 = vmatprep.subr.bf16.mxu1 %v3763_v33 }
 0x26f   :  { %1470 = vmatpush1.bf16.msra.mxu0 %v3741_v26  ;;  %1511 = vmatpush1.bf16.msra.mxu1 %v3769_v35 }
 0x270   :  { %1471 = vmatprep.subr.bf16.mxu0 %v3747_v28  ;;  %1512 = vmatprep.subr.bf16.mxu1 %v3771_v36 }
 0x273   :  { %1472 = vmatpush1.bf16.msra.mxu0 %v3754_v30  ;;  %1513 = vmatpush1.bf16.msra.mxu1 %v3779_v39 }
 0x274   :  { %1473 = vmatprep.subr.bf16.mxu0 %v3760_v32  ;;  %1514 = vmatprep.subr.bf16.mxu1 %v3784_v41  ;;  %v941_v32 = vld [vmem:[#allocation2 + $0x2] ss:$8 sm:$0xf] }
 0x277   :  { %1474 = vmatpush1.bf16.msra.mxu0 %v3766_v34  ;;  %1515 = vmatpush1.bf16.msra.mxu1 %v3794_v44 }
 0x278   :  { %1475 = vmatprep.subr.bf16.mxu0 %v3774_v37  ;;  %1516 = vmatprep.subr.bf16.mxu1 %v3797_v45 }
 0x27b   :  { %1476 = vmatpush1.bf16.msra.mxu0 %v3777_v38  ;;  %1517 = vmatpush1.bf16.msra.mxu1 %v3804_v47 }
 0x27c   :  { %1477 = vmatprep.subr.bf16.mxu0 %v3781_v40  ;;  %1518 = vmatprep.subr.bf16.mxu1 %v3808_v48 }
 0x27f   :  { %1478 = vmatpush1.bf16.msra.mxu0 %v3789_v42  ;;  %1519 = vmatpush1.bf16.msra.mxu1 %v3813_v49 }
 0x280   :  { %1791 = vmatprep.subr.bf16.mxu0 %v3947_v60  ;;  %1832 = vmatprep.subr.bf16.mxu1 %v3949_v54 }
 0x335   :  { %v1169_v17 = vpop.f32.mrb[8].mxu0  ;;  %v1210_v19 = vpop.f32.mrb[16].mxu1 }
 0x336   :  { %v1171_v20 = vpop.f32.mrb[9].mxu0  ;;  %v1212_v21 = vpop.f32.mrb[17].mxu1 }
 0x337   :  { %v1221_v22 = vcombine.low %v1169_v17, %v1171_v20  ;;  %v1222_v23 = vcombine.low %v1210_v19, %v1212_v21  ;;  %v1173_v24 = vpop.f32.mrb[10].mxu0  ;;  %v1214_v25 = vpop.f32.mrb[18].mxu1  ;;  %v4014_v17 = vld [vmem:[#allocation7 + $0xa8] ss:$16 sps:$4 sm:$0xff]   ;;  %v4016_v19 = vld [vmem:[#allocation7 + $0xc4] ss:$16 sps:$4 sm:$0xff]  }
 0x338   :  { %v1174_v26 = vpop.f32.mrb[11].mxu0  ;;  %v1215_v27 = vpop.f32.mrb[19].mxu1  ;;  %v4019_v20 = vld [vmem:[#allocation7 + $0xcc] ss:$16 sps:$4 sm:$0xff]   ;;  %v4022_v21 = vld [vmem:[#allocation7 + $0xc0] ss:$16 sps:$4 sm:$0xff]  }
 0x339   :  { %v1229_v28 = vrot.slane %v1221_v22, %v3854_v8  ;;  %v1236_v29 = vrot.slane %v1222_v23, %v3854_v8  ;;  %v4026_v22 = vld [vmem:[#allocation7 + $0xc8] ss:$16 sps:$4 sm:$0xff]   ;;  %v4028_v23 = vld [vmem:[#allocation7 + $0xe4] ss:$16 sps:$4 sm:$0xff]   ;;  %v4031_v24 = vld [vmem:[#allocation7 + $0xec] ss:$16 sps:$4 sm:$0xff]  }
 0x33a   :  { %v4034_v25 = vld [vmem:[#allocation7 + $0xe0] ss:$16 sps:$4 sm:$0xff]   ;;  %v4038_v26 = vld [vmem:[#allocation7 + $0xe8] ss:$16 sps:$4 sm:$0xff]  }
 0x33b   :  { %v1237_v30 = vcombine.low %v1229_v28, %v1236_v29 }
 0x33d   :  { %v1244_v31 = vrot.slane %v1237_v30, %v3854_v8 }
 0x33f   :  { %v1246_v33 = vadd.f32 %v1244_v31, %v941_v32 }
 0x341   :  { %v3148_v34 = vmul.f32 -1.442695, %v1246_v33  ;;  %v1254_v37 = vrot.slane %v1246_v33, 3 }
 0x343   :  { %3472 = vpow2.f32 %v3148_v34 }
 0x34d   :  { %v3473_v35 = vpop.eup %3472 }
 0x34e   :  { %v1250_v36 = vadd.f32 1.0, %v3473_v35 }
 0x350   :  { %3474 = vrcp.f32 %v1250_v36 }
 0x351   :  { %3476 = vtanh.f32 %v1254_v37 }
 0x35a   :  { %v3475_v38 = vpop.eup %3474 }
 0x35b   :  { %v1258_v39 = vrot.slane %v3475_v38, 1  ;;  %v3477_v40 = vpop.eup %3476  ;;  %v1264_v45 = vrot.slane %v3475_v38, 2 }
 0x35c   :  { %v1261_v41 = vmul.f32 %v3477_v40, %v3475_v38 }
 0x35d   :  { %v1260_v42 = vmul.f32 %v1258_v39, %v3903_v14  ;;  %v3998_v14 = vld [vmem:[#allocation7 + $0x80] ss:$16 sps:$4 sm:$0xff]  }
 0x35f   :  { %v3942_v44 = vadd.f32 %v1261_v41, %v1260_v42  ;;  %v1269_v41 = vld [vmem:[#allocation2 + $0x3] ss:$8 sm:$0xf] }
 0x361   :  { %3478 = vtanh.f32 %v3942_v44 }
 0x36b   :  { %v3479_v47 = vpop.eup %3478 }
 0x36c   :  { %v1266_v48 = vmul.f32 %v3479_v47, %v1264_v45 }
 0x36e   :  { %1267 = vst [vmem:[#allocation3 + $0x2] sm:$0x1] %v1266_v48  ;;  %v1270_v49 = vpack.c.bf16 %v1266_v48, %v1266_v48 }
 0x370   :  { %1496 = vmatmul.mubr.bf16.vlgmr.msra.gmra.mrb[12].mxu0 %v1270_v49  ;;  %1537 = vmatmul.mubr.bf16.vlgmr.msra.gmra.mrb[20].mxu1 %v1270_v49 }
 0x371   :  { %1823 = vmatprep.mubr.bf16.mxu0 %v3579_v11  ;;  %1864 = vmatprep.mubr.bf16.mxu1 %v3579_v11 }
 0x372   :  { %1792 = vmatpush1.bf16.msra.mxu0 %v3951_v51  ;;  %1833 = vmatpush1.bf16.msra.mxu1 %v3953_v55 }
 0x373   :  { %1793 = vmatprep.subr.bf16.mxu0 %v3959_v57  ;;  %1834 = vmatprep.subr.bf16.mxu1 %v3961_v56 }
 0x376   :  { %1794 = vmatpush1.bf16.msra.mxu0 %v3963_v59  ;;  %1835 = vmatpush1.bf16.msra.mxu1 %v3965_v16 }
 0x377   :  { %1795 = vmatprep.subr.bf16.mxu0 %v3971_v62  ;;  %1836 = vmatprep.subr.bf16.mxu1 %v3973_v18 }
 0x37a   :  { %1796 = vmatpush1.bf16.msra.mxu0 %v3975_v58  ;;  %1837 = vmatpush1.bf16.msra.mxu1 %v3977_v53 }
 0x37b   :  { %1797 = vmatprep.subr.bf16.mxu0 %v3985_v63  ;;  %1838 = vmatprep.subr.bf16.mxu1 %v3989_v10 }
 0x37e   :  { %1798 = vmatpush1.bf16.msra.mxu0 %v3983_v61  ;;  %1839 = vmatpush1.bf16.msra.mxu1 %v3987_v9 }
 0x37f   :  { %1799 = vmatprep.subr.bf16.mxu0 %v3991_v12  ;;  %1840 = vmatprep.subr.bf16.mxu1 %v3994_v13 }
 0x382   :  { %1800 = vmatpush1.bf16.msra.mxu0 %v3998_v14  ;;  %1841 = vmatpush1.bf16.msra.mxu1 %v4002_v15 }
 0x383   :  { %1801 = vmatprep.subr.bf16.mxu0 %v4004_v43  ;;  %1842 = vmatprep.subr.bf16.mxu1 %v4007_v46 }
 0x386   :  { %1802 = vmatpush1.bf16.msra.mxu0 %v4010_v52  ;;  %1843 = vmatpush1.bf16.msra.mxu1 %v4014_v17 }
 0x387   :  { %1803 = vmatprep.subr.bf16.mxu0 %v4016_v19  ;;  %1844 = vmatprep.subr.bf16.mxu1 %v4019_v20 }
 0x38a   :  { %1804 = vmatpush1.bf16.msra.mxu0 %v4022_v21  ;;  %1845 = vmatpush1.bf16.msra.mxu1 %v4026_v22 }
 0x38b   :  { %1805 = vmatprep.subr.bf16.mxu0 %v4028_v23  ;;  %1846 = vmatprep.subr.bf16.mxu1 %v4031_v24 }
 0x38e   :  { %1806 = vmatpush1.bf16.msra.mxu0 %v4034_v25  ;;  %1847 = vmatpush1.bf16.msra.mxu1 %v4038_v26 }
 0x38f   :  { %2119 = vmatprep.subr.bf16.mxu0 %v3947_v60  ;;  %2160 = vmatprep.subr.bf16.mxu1 %v3949_v54 }
 0x443   :  { %v1497_v27 = vpop.f32.mrb[12].mxu0  ;;  %v1538_v28 = vpop.f32.mrb[20].mxu1 }
 0x444   :  { %v1499_v29 = vpop.f32.mrb[13].mxu0  ;;  %v1540_v30 = vpop.f32.mrb[21].mxu1 }
 0x445   :  { %v1549_v31 = vcombine.low %v1497_v27, %v1499_v29  ;;  %v1550_v32 = vcombine.low %v1538_v28, %v1540_v30  ;;  %v1501_v33 = vpop.f32.mrb[14].mxu0  ;;  %v1542_v34 = vpop.f32.mrb[22].mxu1 }
 0x446   :  { %v1502_v35 = vpop.f32.mrb[15].mxu0  ;;  %v1543_v36 = vpop.f32.mrb[23].mxu1 }
 0x447   :  { %v1557_v37 = vrot.slane %v1549_v31, %v3854_v8  ;;  %v1564_v38 = vrot.slane %v1550_v32, %v3854_v8 }
 0x449   :  { %v1565_v39 = vcombine.low %v1557_v37, %v1564_v38 }
 0x44b   :  { %v1572_v40 = vrot.slane %v1565_v39, %v3854_v8 }
 0x44d   :  { %v1574_v42 = vadd.f32 %v1572_v40, %v1269_v41 }
 0x44f   :  { %v3181_v45 = vmul.f32 -1.442695, %v1574_v42  ;;  %v1582_v49 = vrot.slane %v1574_v42, 3 }
 0x451   :  { %3480 = vpow2.f32 %v3181_v45 }
 0x45b   :  { %v3481_v47 = vpop.eup %3480 }
 0x45c   :  { %v1578_v48 = vadd.f32 1.0, %v3481_v47 }
 0x45e   :  { %3482 = vrcp.f32 %v1578_v48 }
 0x45f   :  { %3484 = vtanh.f32 %v1582_v49 }
 0x468   :  { %v3483_v27 = vpop.eup %3482 }
 0x469   :  { %v1586_v28 = vrot.slane %v3483_v27, 1  ;;  %v3485_v29 = vpop.eup %3484  ;;  %v1592_v32 = vrot.slane %v3483_v27, 2 }
 0x46a   :  { %v1589_v30 = vmul.f32 %v3485_v29, %v3483_v27 }
 0x46b   :  { %v1588_v31 = vmul.f32 %v1586_v28, %v3942_v44 }
 0x46d   :  { %v4049_v33 = vadd.f32 %v1589_v30, %v1588_v31  ;;  %v1597_v30 = vld [vmem:[#allocation2 + $0x4] ss:$8 sm:$0xf] }
 0x46f   :  { %3486 = vtanh.f32 %v4049_v33 }
 0x479   :  { %v3487_v34 = vpop.eup %3486 }
 0x47a   :  { %v1594_v35 = vmul.f32 %v3487_v34, %v1592_v32 }
 0x47c   :  { %1595 = vst [vmem:[#allocation3 + $0x3] sm:$0x1] %v1594_v35  ;;  %v1598_v36 = vpack.c.bf16 %v1594_v35, %v1594_v35 }
 0x47e   :  { %1824 = vmatmul.mubr.bf16.vlgmr.msra.gmra.mrb[16].mxu0 %v1598_v36  ;;  %1865 = vmatmul.mubr.bf16.vlgmr.msra.gmra.mrb[24].mxu1 %v1598_v36 }
 0x47f   :  { %2120 = vmatpush1.bf16.msra.mxu0 %v3951_v51  ;;  %2161 = vmatpush1.bf16.msra.mxu1 %v3953_v55 }
 0x480   :  { %2121 = vmatprep.subr.bf16.mxu0 %v3959_v57  ;;  %2162 = vmatprep.subr.bf16.mxu1 %v3961_v56 }
 0x481   :  { %2151 = vmatprep.mubr.bf16.mxu0 %v3579_v11  ;;  %2192 = vmatprep.mubr.bf16.mxu1 %v3579_v11 }
 0x483   :  { %2122 = vmatpush1.bf16.msra.mxu0 %v3963_v59  ;;  %2163 = vmatpush1.bf16.msra.mxu1 %v3965_v16 }
 0x484   :  { %2123 = vmatprep.subr.bf16.mxu0 %v3971_v62  ;;  %2164 = vmatprep.subr.bf16.mxu1 %v3973_v18 }
 0x487   :  { %2124 = vmatpush1.bf16.msra.mxu0 %v3975_v58  ;;  %2165 = vmatpush1.bf16.msra.mxu1 %v3977_v53 }
 0x488   :  { %2125 = vmatprep.subr.bf16.mxu0 %v3985_v63  ;;  %2166 = vmatprep.subr.bf16.mxu1 %v3989_v10 }
 0x48b   :  { %2126 = vmatpush1.bf16.msra.mxu0 %v3983_v61  ;;  %2167 = vmatpush1.bf16.msra.mxu1 %v3987_v9 }
 0x48c   :  { %2127 = vmatprep.subr.bf16.mxu0 %v3991_v12  ;;  %2168 = vmatprep.subr.bf16.mxu1 %v3994_v13 }
 0x48f   :  { %2128 = vmatpush1.bf16.msra.mxu0 %v3998_v14  ;;  %2169 = vmatpush1.bf16.msra.mxu1 %v4002_v15 }
 0x490   :  { %2129 = vmatprep.subr.bf16.mxu0 %v4004_v43  ;;  %2170 = vmatprep.subr.bf16.mxu1 %v4007_v46 }
 0x493   :  { %2130 = vmatpush1.bf16.msra.mxu0 %v4010_v52  ;;  %2171 = vmatpush1.bf16.msra.mxu1 %v4014_v17 }
 0x494   :  { %2131 = vmatprep.subr.bf16.mxu0 %v4016_v19  ;;  %2172 = vmatprep.subr.bf16.mxu1 %v4019_v20 }
 0x497   :  { %2132 = vmatpush1.bf16.msra.mxu0 %v4022_v21  ;;  %2173 = vmatpush1.bf16.msra.mxu1 %v4026_v22 }
 0x498   :  { %2133 = vmatprep.subr.bf16.mxu0 %v4028_v23  ;;  %2174 = vmatprep.subr.bf16.mxu1 %v4031_v24 }
 0x49b   :  { %2134 = vmatpush1.bf16.msra.mxu0 %v4034_v25  ;;  %2175 = vmatpush1.bf16.msra.mxu1 %v4038_v26 }
 0x49c   :  { %2447 = vmatprep.subr.bf16.mxu0 %v3947_v60  ;;  %2488 = vmatprep.subr.bf16.mxu1 %v3949_v54 }
 0x551   :  { %v1825_v44 = vpop.f32.mrb[16].mxu0  ;;  %v1866_v37 = vpop.f32.mrb[24].mxu1 }
 0x552   :  { %v1827_v38 = vpop.f32.mrb[17].mxu0  ;;  %v1868_v39 = vpop.f32.mrb[25].mxu1 }
 0x553   :  { %v1877_v40 = vcombine.low %v1825_v44, %v1827_v38  ;;  %v1878_v41 = vcombine.low %v1866_v37, %v1868_v39  ;;  %v1829_v42 = vpop.f32.mrb[18].mxu0  ;;  %v1870_v45 = vpop.f32.mrb[26].mxu1 }
 0x554   :  { %v1830_v47 = vpop.f32.mrb[19].mxu0  ;;  %v1871_v48 = vpop.f32.mrb[27].mxu1 }
 0x555   :  { %v1885_v49 = vrot.slane %v1877_v40, %v3854_v8  ;;  %v1892_v27 = vrot.slane %v1878_v41, %v3854_v8 }
 0x557   :  { %v1893_v28 = vcombine.low %v1885_v49, %v1892_v27 }
 0x559   :  { %v1900_v29 = vrot.slane %v1893_v28, %v3854_v8 }
 0x55b   :  { %v1902_v31 = vadd.f32 %v1900_v29, %v1597_v30 }
 0x55d   :  { %v3214_v32 = vmul.f32 -1.442695, %v1902_v31  ;;  %v1910_v36 = vrot.slane %v1902_v31, 3 }
 0x55f   :  { %3488 = vpow2.f32 %v3214_v32 }
 0x569   :  { %v3489_v34 = vpop.eup %3488 }
 0x56a   :  { %v1906_v35 = vadd.f32 1.0, %v3489_v34 }
 0x56c   :  { %3490 = vrcp.f32 %v1906_v35 }
 0x56d   :  { %3492 = vtanh.f32 %v1910_v36 }
 0x576   :  { %v3491_v44 = vpop.eup %3490 }
 0x577   :  { %v1914_v37 = vrot.slane %v3491_v44, 1  ;;  %v3493_v38 = vpop.eup %3492  ;;  %v1920_v41 = vrot.slane %v3491_v44, 2 }
 0x578   :  { %v1917_v39 = vmul.f32 %v3493_v38, %v3491_v44 }
 0x579   :  { %v1916_v40 = vmul.f32 %v1914_v37, %v4049_v33 }
 0x57b   :  { %v4090_v42 = vadd.f32 %v1917_v39, %v1916_v40 }
 0x57d   :  { %3494 = vtanh.f32 %v4090_v42 }
 0x587   :  { %v3495_v45 = vpop.eup %3494 }
 0x588   :  { %v1922_v47 = vmul.f32 %v3495_v45, %v1920_v41 }
 0x58a   :  { %1923 = vst [vmem:[#allocation3 + $0x4] sm:$0x1] %v1922_v47  ;;  %v1926_v48 = vpack.c.bf16 %v1922_v47, %v1922_v47 }
 0x58c   :  { %2152 = vmatmul.mubr.bf16.vlgmr.msra.gmra.mrb[20].mxu0 %v1926_v48  ;;  %2193 = vmatmul.mubr.bf16.vlgmr.msra.gmra.mrb[28].mxu1 %v1926_v48 }
 0x58d   :  { %2448 = vmatpush1.bf16.msra.mxu0 %v3951_v51  ;;  %2489 = vmatpush1.bf16.msra.mxu1 %v3953_v55 }
 0x58e   :  { %2449 = vmatprep.subr.bf16.mxu0 %v3959_v57  ;;  %2490 = vmatprep.subr.bf16.mxu1 %v3961_v56 }
 0x58f   :  { %2479 = vmatprep.mubr.bf16.mxu0 %v3579_v11  ;;  %2520 = vmatprep.mubr.bf16.mxu1 %v3579_v11 }
 0x591   :  { %2450 = vmatpush1.bf16.msra.mxu0 %v3963_v59  ;;  %2491 = vmatpush1.bf16.msra.mxu1 %v3965_v16 }
 0x592   :  { %2451 = vmatprep.subr.bf16.mxu0 %v3971_v62  ;;  %2492 = vmatprep.subr.bf16.mxu1 %v3973_v18 }
 0x595   :  { %2452 = vmatpush1.bf16.msra.mxu0 %v3975_v58  ;;  %2493 = vmatpush1.bf16.msra.mxu1 %v3977_v53 }
 0x596   :  { %2453 = vmatprep.subr.bf16.mxu0 %v3985_v63  ;;  %2494 = vmatprep.subr.bf16.mxu1 %v3989_v10 }
 0x599   :  { %2454 = vmatpush1.bf16.msra.mxu0 %v3983_v61  ;;  %2495 = vmatpush1.bf16.msra.mxu1 %v3987_v9 }
 0x59a   :  { %2455 = vmatprep.subr.bf16.mxu0 %v3991_v12  ;;  %2496 = vmatprep.subr.bf16.mxu1 %v3994_v13 }
 0x59d   :  { %2456 = vmatpush1.bf16.msra.mxu0 %v3998_v14  ;;  %2497 = vmatpush1.bf16.msra.mxu1 %v4002_v15 }
 0x59e   :  { %2457 = vmatprep.subr.bf16.mxu0 %v4004_v43  ;;  %2498 = vmatprep.subr.bf16.mxu1 %v4007_v46 }
 0x5a1   :  { %2458 = vmatpush1.bf16.msra.mxu0 %v4010_v52  ;;  %2499 = vmatpush1.bf16.msra.mxu1 %v4014_v17 }
 0x5a2   :  { %2459 = vmatprep.subr.bf16.mxu0 %v4016_v19  ;;  %2500 = vmatprep.subr.bf16.mxu1 %v4019_v20 }
 0x5a5   :  { %2460 = vmatpush1.bf16.msra.mxu0 %v4022_v21  ;;  %2501 = vmatpush1.bf16.msra.mxu1 %v4026_v22 }
 0x5a6   :  { %2461 = vmatprep.subr.bf16.mxu0 %v4028_v23  ;;  %2502 = vmatprep.subr.bf16.mxu1 %v4031_v24 }
 0x5a9   :  { %2462 = vmatpush1.bf16.msra.mxu0 %v4034_v25  ;;  %2503 = vmatpush1.bf16.msra.mxu1 %v4038_v26 }
 0x5aa   :  { %2775 = vmatprep.subr.bf16.mxu0 %v3947_v60  ;;  %2816 = vmatprep.subr.bf16.mxu1 %v3949_v54  ;;  %v1925_v60 = vld [vmem:[#allocation2 + $0x5] ss:$8 sm:$0xf] }
 0x65f   :  { %v2153_v33 = vpop.f32.mrb[20].mxu0  ;;  %v2194_v49 = vpop.f32.mrb[28].mxu1 }
 0x660   :  { %v2155_v27 = vpop.f32.mrb[21].mxu0  ;;  %v2196_v28 = vpop.f32.mrb[29].mxu1 }
 0x661   :  { %v2205_v29 = vcombine.low %v2153_v33, %v2155_v27  ;;  %v2206_v30 = vcombine.low %v2194_v49, %v2196_v28  ;;  %v2157_v31 = vpop.f32.mrb[22].mxu0  ;;  %v2198_v32 = vpop.f32.mrb[30].mxu1 }
 0x662   :  { %v2158_v34 = vpop.f32.mrb[23].mxu0  ;;  %v2199_v35 = vpop.f32.mrb[31].mxu1 }
 0x663   :  { %v2213_v36 = vrot.slane %v2205_v29, %v3854_v8  ;;  %v2220_v44 = vrot.slane %v2206_v30, %v3854_v8 }
 0x665   :  { %v2221_v37 = vcombine.low %v2213_v36, %v2220_v44 }
 0x667   :  { %v2228_v38 = vrot.slane %v2221_v37, %v3854_v8 }
 0x669   :  { %v2230_v39 = vadd.f32 %v2228_v38, %v1925_v60 }
 0x66b   :  { %v3247_v54 = vmul.f32 -1.442695, %v2230_v39  ;;  %v2238_v45 = vrot.slane %v2230_v39, 3 }
 0x66d   :  { %3496 = vpow2.f32 %v3247_v54 }
 0x677   :  { %v3497_v40 = vpop.eup %3496 }
 0x678   :  { %v2234_v41 = vadd.f32 1.0, %v3497_v40 }
 0x67a   :  { %3498 = vrcp.f32 %v2234_v41 }
 0x67b   :  { %3500 = vtanh.f32 %v2238_v45 }
 0x684   :  { %v3499_v47 = vpop.eup %3498 }
 0x685   :  { %v2242_v48 = vrot.slane %v3499_v47, 1  ;;  %v3501_v33 = vpop.eup %3500  ;;  %v2248_v29 = vrot.slane %v3499_v47, 2 }
 0x686   :  { %v2245_v49 = vmul.f32 %v3501_v33, %v3499_v47  ;;  %v2581_v47 = vld [vmem:[#allocation2 + $0x7] ss:$8 sm:$0xf] }
 0x687   :  { %v2244_v27 = vmul.f32 %v2242_v48, %v4090_v42 }
 0x689   :  { %v4131_v28 = vadd.f32 %v2245_v49, %v2244_v27 }
 0x68b   :  { %3502 = vtanh.f32 %v4131_v28 }
 0x695   :  { %v3503_v30 = vpop.eup %3502 }
 0x696   :  { %v2250_v31 = vmul.f32 %v3503_v30, %v2248_v29 }
 0x698   :  { %2251 = vst [vmem:[#allocation3 + $0x5] sm:$0x1] %v2250_v31  ;;  %v2254_v32 = vpack.c.bf16 %v2250_v31, %v2250_v31 }
 0x69a   :  { %2480 = vmatmul.mubr.bf16.vlgmr.msra.gmra.mrb[24].mxu0 %v2254_v32  ;;  %2521 = vmatmul.mubr.bf16.vlgmr.msra.gmra.mrb[32].mxu1 %v2254_v32 }
 0x69b   :  { %2776 = vmatpush1.bf16.msra.mxu0 %v3951_v51  ;;  %2817 = vmatpush1.bf16.msra.mxu1 %v3953_v55 }
 0x69c   :  { %2777 = vmatprep.subr.bf16.mxu0 %v3959_v57  ;;  %2818 = vmatprep.subr.bf16.mxu1 %v3961_v56 }
 0x69d   :  { %2807 = vmatprep.mubr.bf16.mxu0 %v3579_v11  ;;  %2848 = vmatprep.mubr.bf16.mxu1 %v3579_v11 }
 0x69f   :  { %2778 = vmatpush1.bf16.msra.mxu0 %v3963_v59  ;;  %2819 = vmatpush1.bf16.msra.mxu1 %v3965_v16 }
 0x6a0   :  { %2779 = vmatprep.subr.bf16.mxu0 %v3971_v62  ;;  %2820 = vmatprep.subr.bf16.mxu1 %v3973_v18 }
 0x6a3   :  { %2780 = vmatpush1.bf16.msra.mxu0 %v3975_v58  ;;  %2821 = vmatpush1.bf16.msra.mxu1 %v3977_v53 }
 0x6a4   :  { %2781 = vmatprep.subr.bf16.mxu0 %v3985_v63  ;;  %2822 = vmatprep.subr.bf16.mxu1 %v3989_v10  ;;  %v2253_v10 = vld [vmem:[#allocation2 + $0x6] ss:$8 sm:$0xf] }
 0x6a7   :  { %2782 = vmatpush1.bf16.msra.mxu0 %v3983_v61  ;;  %2823 = vmatpush1.bf16.msra.mxu1 %v3987_v9 }
 0x6a8   :  { %2783 = vmatprep.subr.bf16.mxu0 %v3991_v12  ;;  %2824 = vmatprep.subr.bf16.mxu1 %v3994_v13 }
 0x6ab   :  { %2784 = vmatpush1.bf16.msra.mxu0 %v3998_v14  ;;  %2825 = vmatpush1.bf16.msra.mxu1 %v4002_v15 }
 0x6ac   :  { %2785 = vmatprep.subr.bf16.mxu0 %v4004_v43  ;;  %2826 = vmatprep.subr.bf16.mxu1 %v4007_v46 }
 0x6af   :  { %2786 = vmatpush1.bf16.msra.mxu0 %v4010_v52  ;;  %2827 = vmatpush1.bf16.msra.mxu1 %v4014_v17 }
 0x6b0   :  { %2787 = vmatprep.subr.bf16.mxu0 %v4016_v19  ;;  %2828 = vmatprep.subr.bf16.mxu1 %v4019_v20 }
 0x6b3   :  { %2788 = vmatpush1.bf16.msra.mxu0 %v4022_v21  ;;  %2829 = vmatpush1.bf16.msra.mxu1 %v4026_v22 }
 0x6b4   :  { %2789 = vmatprep.subr.bf16.mxu0 %v4028_v23  ;;  %2830 = vmatprep.subr.bf16.mxu1 %v4031_v24 }
 0x6b7   :  { %2790 = vmatpush1.bf16.msra.mxu0 %v4034_v25  ;;  %2831 = vmatpush1.bf16.msra.mxu1 %v4038_v26 }
 0x76d   :  { %v2481_v11 = vpop.f32.mrb[24].mxu0  ;;  %v2522_v51 = vpop.f32.mrb[32].mxu1 }
 0x76e   :  { %v2483_v55 = vpop.f32.mrb[25].mxu0  ;;  %v2524_v57 = vpop.f32.mrb[33].mxu1 }
 0x76f   :  { %v2533_v56 = vcombine.low %v2481_v11, %v2483_v55  ;;  %v2534_v59 = vcombine.low %v2522_v51, %v2524_v57  ;;  %v2485_v16 = vpop.f32.mrb[26].mxu0  ;;  %v2526_v62 = vpop.f32.mrb[34].mxu1 }
 0x770   :  { %v2486_v18 = vpop.f32.mrb[27].mxu0  ;;  %v2527_v58 = vpop.f32.mrb[35].mxu1 }
 0x771   :  { %v2541_v53 = vrot.slane %v2533_v56, %v3854_v8  ;;  %v2548_v61 = vrot.slane %v2534_v59, %v3854_v8 }
 0x773   :  { %v2549_v63 = vcombine.low %v2541_v53, %v2548_v61 }
 0x775   :  { %v2556_v9 = vrot.slane %v2549_v63, %v3854_v8 }
 0x777   :  { %v2558_v12 = vadd.f32 %v2556_v9, %v2253_v10 }
 0x779   :  { %v3280_v13 = vmul.f32 -1.442695, %v2558_v12  ;;  %v2566_v43 = vrot.slane %v2558_v12, 3 }
 0x77b   :  { %3504 = vpow2.f32 %v3280_v13 }
 0x785   :  { %v3505_v14 = vpop.eup %3504 }
 0x786   :  { %v2562_v15 = vadd.f32 1.0, %v3505_v14 }
 0x788   :  { %3506 = vrcp.f32 %v2562_v15 }
 0x789   :  { %3508 = vtanh.f32 %v2566_v43 }
 0x792   :  { %v3507_v46 = vpop.eup %3506 }
 0x793   :  { %v2570_v52 = vrot.slane %v3507_v46, 1  ;;  %v3509_v17 = vpop.eup %3508  ;;  %v2576_v22 = vrot.slane %v3507_v46, 2 }
 0x794   :  { %v2573_v19 = vmul.f32 %v3509_v17, %v3507_v46 }
 0x795   :  { %v2572_v20 = vmul.f32 %v2570_v52, %v4131_v28 }
 0x797   :  { %v2574_v21 = vadd.f32 %v2573_v19, %v2572_v20 }
 0x799   :  { %3510 = vtanh.f32 %v2574_v21 }
 0x7a3   :  { %v3511_v23 = vpop.eup %3510 }
 0x7a4   :  { %v2578_v24 = vmul.f32 %v3511_v23, %v2576_v22 }
 0x7a6   :  { %2579 = vst [vmem:[#allocation3 + $0x6] sm:$0x1] %v2578_v24  ;;  %v2582_v25 = vpack.c.bf16 %v2578_v24, %v2578_v24 }
 0x7a8   :  { %2808 = vmatmul.mubr.bf16.vlgmr.msra.gmra.mrb[28].mxu0 %v2582_v25  ;;  %2849 = vmatmul.mubr.bf16.vlgmr.msra.gmra.mrb[36].mxu1 %v2582_v25 }
 0x87b   :  { %v2809_v26 = vpop.f32.mrb[28].mxu0  ;;  %v2850_v42 = vpop.f32.mrb[36].mxu1 }
 0x87c   :  { %v2811_v34 = vpop.f32.mrb[29].mxu0  ;;  %v2852_v35 = vpop.f32.mrb[37].mxu1 }
 0x87d   :  { %v2861_v36 = vcombine.low %v2809_v26, %v2811_v34  ;;  %v2862_v44 = vcombine.low %v2850_v42, %v2852_v35  ;;  %v2813_v37 = vpop.f32.mrb[30].mxu0  ;;  %v2854_v38 = vpop.f32.mrb[38].mxu1 }
 0x87e   :  { %v2814_v60 = vpop.f32.mrb[31].mxu0  ;;  %v2855_v39 = vpop.f32.mrb[39].mxu1 }
 0x87f   :  { %v2869_v54 = vrot.slane %v2861_v36, %v3854_v8  ;;  %v2876_v40 = vrot.slane %v2862_v44, %v3854_v8 }
 0x881   :  { %v2877_v41 = vcombine.low %v2869_v54, %v2876_v40 }
 0x883   :  { %v2884_v45 = vrot.slane %v2877_v41, %v3854_v8 }
 0x885   :  { %v2886_v48 = vadd.f32 %v2884_v45, %v2581_v47 }
 0x887   :  { %v3313_v33 = vmul.f32 -1.442695, %v2886_v48  ;;  %v2894_v28 = vrot.slane %v2886_v48, 3 }
 0x889   :  { %3512 = vpow2.f32 %v3313_v33 }
 0x893   :  { %v3513_v49 = vpop.eup %3512 }
 0x894   :  { %v2890_v27 = vadd.f32 1.0, %v3513_v49 }
 0x896   :  { %3514 = vrcp.f32 %v2890_v27 }
 0x897   :  { %3516 = vtanh.f32 %v2894_v28 }
 0x8a0   :  { %v3515_v29 = vpop.eup %3514 }
 0x8a1   :  { %v2898_v30 = vrot.slane %v3515_v29, 1  ;;  %v3517_v31 = vpop.eup %3516  ;;  %v2904_v8 = vrot.slane %v3515_v29, 2 }
 0x8a2   :  { %v2901_v11 = vmul.f32 %v3517_v31, %v3515_v29 }
 0x8a3   :  { %v2900_v32 = vmul.f32 %v2898_v30, %v2574_v21 }
 0x8a5   :  { %v2902_v51 = vadd.f32 %v2901_v11, %v2900_v32 }
 0x8a7   :  { %3518 = vtanh.f32 %v2902_v51  ;;  %2909 = vst [vmem:[%s4210_s10] sm:$0x1] %v2902_v51 }
 0x8b1   :  { %v3519_v55 = vpop.eup %3518 }
 0x8b2   :  { %v2906_v57 = vmul.f32 %v3519_v55, %v2904_v8 }
 0x8b4   :  { %2907 = vst [vmem:[#allocation3 + $0x7] sm:$0x1] %v2906_v57  ;;  %2908 = vst [vmem:[%s4209_s9] sm:$0x1] %v2906_v57 }
 0x8b5   :  { %3570 = dma.done.wait [#allocation6], 1024 }
 0x8b6   :  { %3571 = vsyncadd [#allocation6], 4294966272 }
 0x8b7   :  { %3572 = dma.done.wait [#allocation6 + $0x1], 16 }
 0x8b8   :  { %3573 = vsyncadd [#allocation6 + $0x1], 4294967280  ;;  %v3581_v56 = vmov 0.0   ;;  %vm3582_vm1 = vmmov 0   ;;  %s3583_s9 = smov [#allocation10]  }
 0x8b9   :  { %3326 = vmatprep.subr.bf16.mxu0 %v3581_v56  ;;  %3342 = vmatprep.mubr.msk.bf16.mxu0 %vm3582_vm1, %v3581_v56  ;;  %s2996_s10 = sshll.u32 %s3583_s9, 4  ;;  %s2997_s10 = int_to_ptr.vmem [resolvable:$true] %s2996_s10 }
 0x8ba   :  { %3327 = vmatpush3.bf16.msra.mxu0 %v3654_v0  ;;  %s3546_s16 = scalar_lea.vmem %s2997_s10, 128  ;;  %p3551_p9 = scmp.lt.s32.totalorder %s2997_s10, %s2997_s10 }
 0x8bb   :  { %3328 = vmatprep.subr.bf16.mxu0 %v3581_v56  ;;  %v2917_v59 = vld [vmem:[#allocation3] sm:$0xff]  ;;  %p3547_p8 = scmp.ne.s32.totalorder %s2997_s10, %s3546_s16  ;;  %p3552_p10 = scmp.lt.s32.totalorder %s3546_s16, %s3546_s16 }
 0x8bc   :  { %v2918_v0 = vpack.c.bf16 %v2917_v59, %v2917_v59 }
 0x8bd   :  { %p3553_p11 = por %p3552_p10, %p3551_p9 }
 0x8be   :  { %3329 = vmatpush3.bf16.msra.mxu0 %v3659_v1  ;;  %v3314_v1 = vld [vmem:[#allocation5] ss:$0 sm:$0xff] }
 0x8bf   :  { %3330 = vmatprep.subr.bf16.mxu0 %v3581_v56  ;;  %p3554_p12 = pnand %p3553_p11, %p3547_p8 }
 0x8c2   :  { %3331 = vmatpush3.bf16.msra.mxu0 %v3664_v2 }
 0x8c3   :  { %3332 = vmatprep.subr.bf16.mxu0 %v3581_v56 }
 0x8c6   :  { %3333 = vmatpush3.bf16.msra.mxu0 %v3669_v3 }
 0x8c7   :  { %3334 = vmatprep.subr.bf16.mxu0 %v3581_v56 }
 0x8ca   :  { %3335 = vmatpush3.bf16.msra.mxu0 %v3674_v4 }
 0x8cb   :  { %3336 = vmatprep.subr.bf16.mxu0 %v3581_v56 }
 0x8ce   :  { %3337 = vmatpush3.bf16.msra.mxu0 %v3679_v5 }
 0x8cf   :  { %3338 = vmatprep.subr.bf16.mxu0 %v3581_v56 }
 0x8d2   :  { %3339 = vmatpush3.bf16.msra.mxu0 %v3684_v6  ;;  %v2976_v6 = vand.u32 127, %v153_v50 }
 0x8d3   :  { %3340 = vmatprep.subr.bf16.mxu0 %v3581_v56 }
 0x8d4   :  { %vm2977_vm2 = vcmp.lt.s32.totalorder %v2976_v6, 32 }
 0x8d6   :  { %3341 = vmatpush3.bf16.msra.mxu0 %v3689_v7 }
 0x8d9   :  { %3343 = vmatmul.mubr.bf16.vlgmr.msra.gmra.mrb[32].mxu0 %v2918_v0 }
 0x9ac   :  { %v2968_v2 = vpop.f32.mrb[32].mxu0 }
 0x9ad   :  { %v2969_v16 = vadd.f32 %v3314_v1, %v2968_v2  ;;  %v3344_v62 = vpop.f32.mrb[33].mxu0 }
 0x9ae   :  { %v2971_v3 = vpop.f32.mrb[34].mxu0 }
 0x9af   :  { %v2974_v18 = vmax.f32 %v2969_v16, 0.0  ;;  %v3345_v58 = vpop.f32.mrb[35].mxu0 }
 0x9b1   :  { %2978 = vmax.xlane.f32.xlu0 %v2974_v18 }
 0xa3e   :  { %v2979_v4 = vpop.xlane.xlu0 %2978 }
 0xa3f   :  { %v2980_v53 = vsub.f32 %v2974_v18, %v2979_v4 }
 0xa41   :  { %v2981_v5 = vmul.f32 1.442695, %v2980_v53 }
 0xa43   :  { %3520 = vpow2.f32 %v2981_v5 }
 0xa4d   :  { %v3521_v61 = vpop.eup %3520 }
 0xa4e   :  { %v2983_v63 = vsel %vm2977_vm2, %v3521_v61, 0.0 }
 0xa4f   :  { %2984 = vadd.xlane.f32.xlu0 %v2983_v63 }
 0xadc   :  { %v2985_v7 = vpop.xlane.xlu0 %2984 }
 0xadd   :  { %3522 = vlog2.f32 %v2985_v7 }
 0xae7   :  { %v3523_v9 = vpop.eup %3522 }
 0xae8   :  { %v2987_v10 = vmul.f32 0.6931472, %v3523_v9 }
 0xaea   :  { %v2988_v12 = vsub.f32 %v2980_v53, %v2987_v10 }
 0xaec   :  { %2989 = vst [vmem:[#allocation10] sm:$0xff] %v2988_v12 }
 0xaed   :  { %3557 = shalt.err (!%p3554_p12)
}
 0xaee   :  { %s3558_s19 = scalar_lea.hbm %s4208_s8, 128 }
 0xaef   :  { %p3559_p13 = scmp.ne.s32.totalorder %s4208_s8, %s3558_s19  ;;  %p3562_p0 = scmp.lt.u32.totalorder %s3558_s19, %s4208_s8 }
 0xaf1   :  { %p3564_p1 = pnand %p3562_p0, %p3559_p13 }
 0xaf3   :  { %3567 = shalt.err (!%p3564_p1)
}
 0xaf4   :  { %2999 = dma.vmem_to_hbm [thread:$0]  %s2997_s10, 128, %s4208_s8, [#allocation9]  }
 0xaf5   :  { %3574 = dma.done.wait [#allocation9], 128  }
 0xaf6   :  { %3575 = vsyncadd [#allocation9], 4294967168 }
 0xaf7   :  { %3011 = vsyncpa [#allocation8], 1 }
 0xaf8   :  { %3012 = vsyncpa [#allocation9], 1 }
 0xaf9   :  { %3013 = vsyncmov [#allocation6] }
 0xafc   :  { %s3014_s26 = vpop.sfrf %3013 }
 0xafd   :  { %p3315_p2 = scmp.ne.s32.totalorder %s3014_s26, 0 }
 0xaff   :  { %3018 = shalt.err (%p3315_p2)  }
 0xb00   :  { %3020 = vsyncmov [#allocation6 + $0x1] }
 0xb03   :  { %s3021_s27 = vpop.sfrf %3020 }
 0xb04   :  { %p3316_p3 = scmp.ne.s32.totalorder %s3021_s27, 0 }
 0xb06   :  { %3025 = shalt.err (%p3316_p3)  }

</bundles_post_ra>
